<compile_context>
chip_gen: v7x
topology: tpu7x:2x2x1
jax: 0.10.0
libtpu: 0.0.40
codegen_flags: <defaults>
</compile_context>

<pallas_src>
import functools
import math

import jax
import jax.numpy as jnp
import numpy as np
from jax.experimental import pallas as pl
from jax.experimental.pallas import tpu as pltpu


# ----------------------------------------------------------------------------
# Tiled bias-free GEMM kernel — used for the fused qkv + mu/var projection.
# ----------------------------------------------------------------------------
def _matmul_kernel(x_ref, w_ref, o_ref, *, compute_dtype):
    o_ref[...] = jnp.dot(
        x_ref[...].astype(compute_dtype),
        w_ref[...].astype(compute_dtype),
        preferred_element_type=jnp.float32,
    )


def _pick_tile(dim, align, cap):
    """Largest divisor of `dim` that is a multiple of `align` and <= cap.
    Falls back to the full dimension (always a legal block shape)."""
    if dim <= cap:
        return dim
    for t in range(cap, align - 1, -1):
        if dim % t == 0 and t % align == 0:
            return t
    return dim  # no aligned divisor; full block (legal, possibly VMEM-heavy)


def pallas_matmul(x2d, w, *, compute_dtype=jnp.bfloat16):
    M, K = x2d.shape
    _, N = w.shape
    tm = _pick_tile(M, 8, 512)      # sublane axis: multiple of 8 (or full)
    tn = _pick_tile(N, 128, 512)    # lane axis: multiple of 128 (or full)
    return pl.pallas_call(
        functools.partial(_matmul_kernel, compute_dtype=compute_dtype),
        out_shape=jax.ShapeDtypeStruct((M, N), jnp.float32),
        grid_spec=pltpu.PrefetchScalarGridSpec(
            num_scalar_prefetch=0,
            grid=(M // tm, N // tn),
            in_specs=[
                pl.BlockSpec((tm, K), lambda i, j: (i, 0)),
                pl.BlockSpec((K, tn), lambda i, j: (0, j)),
            ],
            out_specs=pl.BlockSpec((tm, tn), lambda i, j: (i, j)),
        ),
        compiler_params=pltpu.CompilerParams(
            dimension_semantics=("parallel", "parallel")),
    )(x2d, w)


# ----------------------------------------------------------------------------
# Fused per-batch variational attention kernel (all heads in one grid step):
#   - mu / logvar maps from the pre-folded fc_mu_var columns
#   - reparameterize + softmax (single exp for std, approx-reciprocal softmax)
#   - attention output, head-merge and out_proj fused -> lane-dense (S, H) store
#   - per-batch mean KLD (compute_kld)
# ----------------------------------------------------------------------------
def _sa_attention_kernel(bias_ref, q_ref, k_ref, v_ref, eps_ref, qs_ref, kst_ref,
                         wo_ref, bo_ref, o_ref, kld_ref, *,
                         scale, stdvar, compute_dtype):
    q = q_ref[0]       # (nh, S, D)
    k = k_ref[0]       # (nh, S, D)
    v = v_ref[0]       # (nh, S, D)
    eps = eps_ref[0]   # (nh, S, S)
    qs = qs_ref[0]     # (nh, S, 2)   fc_mu_var q-part (folded into the qkv GEMM)
    kst = kst_ref[0]   # (nh, 2, S)   fc_mu_var k-part, pre-transposed

    nh, S, _ = q.shape

    b_mu = bias_ref[0]
    b_lv = bias_ref[1]

    # fc_mu_var(concat(q_x, k_y)) decomposed into q-part + k-part + bias.
    mu = qs[:, :, 0:1] + kst[:, 0:1, :] + b_mu           # (nh, S, S)
    logvar = qs[:, :, 1:2] + kst[:, 1:2, :] + b_lv       # (nh, S, S)

    # reparameterize: eps * exp(0.5*logvar) + mu   (drop_weights is identity)
    std = jnp.exp(0.5 * logvar)                          # reused: var = std*std
    att = eps * std + mu

    # numerically stable softmax over the last dim
    att = att - jnp.max(att, axis=-1, keepdims=True)
    att = jnp.exp(att)
    att = att * pl.reciprocal(jnp.sum(att, axis=-1, keepdims=True), approx=True)

    # attention output, all heads batched: (nh,S,S) x (nh,S,D) -> (nh,S,D)
    o = jnp.einsum('hxy,hyd->hxd',
                   att.astype(compute_dtype), v.astype(compute_dtype),
                   preferred_element_type=jnp.float32)

    # fused out_proj:  out = concat_h(o_h) @ W_out + b_out
    #                      = sum_h o_h @ W_out[h*D:(h+1)*D, :] + b_out
    wo = wo_ref[...].astype(compute_dtype)               # (nh, D, H)
    out = bo_ref[...]                                    # (1, H) -> broadcasts
    for h in range(nh):                                  # nh is small and static
        out = out + jnp.dot(o[h].astype(compute_dtype), wo[h],
                            preferred_element_type=jnp.float32)
    o_ref[0] = out.astype(o_ref.dtype)                   # lane-dense (S, H) store

    # compute_kld(logvar, mu, q, k, scale, stdvar), mean over (heads, S, S)
    det = jnp.einsum('hxd,hyd->hxy',
                     q.astype(compute_dtype), k.astype(compute_dtype),
                     preferred_element_type=jnp.float32) * scale
    inv_s2 = 1.0 / (stdvar * stdvar)
    log_s2 = math.log(stdvar * stdvar)
    diff = mu - det
    kld = -0.5 * (1.0 + logvar - log_s2) + (0.5 * inv_s2) * (diff * diff + std * std)
    kld_ref[...] = (jnp.sum(kld) * (1.0 / (nh * S * S))).reshape(1, 1, 1)


# ----------------------------------------------------------------------------
# SABlock forward (thin JAX glue, hot paths in Pallas kernels).
# ----------------------------------------------------------------------------
def sa_block_forward(x, eps, params, *, num_heads, stdvar=1.0,
                     compute_dtype=jnp.bfloat16):
    B, S, H = x.shape
    D = H // num_heads
    scale = D ** (-0.5)

    w_qkv = params["w_qkv"]               # (H, 3H), bias-free
    w_mv = params["w_mu_var"]             # (2D, 2)
    wq_mv, wk_mv = w_mv[:D], w_mv[D:]     # act on q_x / k_y respectively
    b_mv = params["b_mu_var"]             # (2,)

    # Fold fc_mu_var's q/k projections into the qkv GEMM:
    #   qs[b,s,h,:] = q[b,h,s,:] @ wq_mv = x[b,s,:] @ (W_qkv[:, q_cols(h)] @ wq_mv)
    w_q_cols = w_qkv[:, 0 * H:1 * H].reshape(H, num_heads, D)
    w_k_cols = w_qkv[:, 1 * H:2 * H].reshape(H, num_heads, D)
    w_fold_q = jnp.einsum('ehd,dc->ehc', w_q_cols, wq_mv).reshape(H, 2 * num_heads)
    w_fold_k = jnp.einsum('ehd,dc->ehc', w_k_cols, wk_mv).reshape(H, 2 * num_heads)
    w_aug = jnp.concatenate([w_qkv, w_fold_q, w_fold_k], axis=1)   # (H, 3H + 4nh)

    y = pallas_matmul(x.reshape(B * S, H), w_aug, compute_dtype=compute_dtype)

    # 'b s (qkv l d) -> qkv b l s d'
    qkv = y[:, :3 * H].reshape(B, S, 3, num_heads, D).transpose(2, 0, 3, 1, 4)
    q, k, v = qkv[0], qkv[1], qkv[2]                               # (B, nh, S, D)
    qs = (y[:, 3 * H:3 * H + 2 * num_heads]
          .reshape(B, S, num_heads, 2).transpose(0, 2, 1, 3))      # (B, nh, S, 2)
    kst = (y[:, 3 * H + 2 * num_heads:]
           .reshape(B, S, num_heads, 2).transpose(0, 2, 3, 1))     # (B, nh, 2, S)

    w_out_r = params["w_out"].reshape(num_heads, D, H)             # rows per head
    b_out = params["b_out"].reshape(1, H)

    kernel = functools.partial(_sa_attention_kernel, scale=scale,
                               stdvar=float(stdvar), compute_dtype=compute_dtype)

    out, kld = pl.pallas_call(
        kernel,
        out_shape=(
            jax.ShapeDtypeStruct((B, S, H), jnp.float32),
            jax.ShapeDtypeStruct((B, 1, 1), jnp.float32),
        ),
        grid_spec=pltpu.PrefetchScalarGridSpec(
            num_scalar_prefetch=0,
            grid=(B,),                                   # all heads fused per step
            in_specs=[
                pl.BlockSpec(memory_space=pltpu.SMEM),                       # fc_mu_var bias (2,)
                pl.BlockSpec((1, num_heads, S, D), lambda b: (b, 0, 0, 0)),  # q
                pl.BlockSpec((1, num_heads, S, D), lambda b: (b, 0, 0, 0)),  # k
                pl.BlockSpec((1, num_heads, S, D), lambda b: (b, 0, 0, 0)),  # v
                pl.BlockSpec((1, num_heads, S, S), lambda b: (b, 0, 0, 0)),  # eps
                pl.BlockSpec((1, num_heads, S, 2), lambda b: (b, 0, 0, 0)),  # qs
                pl.BlockSpec((1, num_heads, 2, S), lambda b: (b, 0, 0, 0)),  # ks^T
                pl.BlockSpec((num_heads, D, H), lambda b: (0, 0, 0)),        # W_out
                pl.BlockSpec((1, H), lambda b: (0, 0)),                      # b_out
            ],
            out_specs=[
                pl.BlockSpec((1, S, H), lambda b: (b, 0, 0)),   # final output (lane-dense)
                pl.BlockSpec((1, 1, 1), lambda b: (b, 0, 0)),   # per-batch mean KLD
            ],
        ),
        compiler_params=pltpu.CompilerParams(
            dimension_semantics=("parallel",),
            vmem_limit_bytes=64 * 1024 * 1024),
    )(b_mv, q, k, v, eps, qs, kst, w_out_r, b_out)

    # drop_output is identity (dropout_rate = 0)
    return out, kld.reshape(B)


# ----------------------------------------------------------------------------
# Pure-JAX f32 reference (mirrors the PyTorch forward, incl. the explicit concat).
# ----------------------------------------------------------------------------
def ref_forward(x, eps, params, *, num_heads, stdvar=1.0):
    B, S, H = x.shape
    D = H // num_heads
    scale = D ** (-0.5)
    qkv = x @ params["w_qkv"]
    qkv = qkv.reshape(B, S, 3, num_heads, D).transpose(2, 0, 3, 1, 4)
    q, k, v = qkv[0], qkv[1], qkv[2]
    q_mlp = jnp.broadcast_to(q[:, :, :, None, :], (B, num_heads, S, S, D))
    k_mlp = jnp.broadcast_to(k[:, :, None, :, :], (B, num_heads, S, S, D))
    qk = jnp.concatenate([q_mlp, k_mlp], axis=-1)
    m = qk @ params["w_mu_var"] + params["b_mu_var"]
    mu, logvar = m[..., 0], m[..., 1]
    att = eps * jnp.exp(0.5 * logvar) + mu
    att = jax.nn.softmax(att, axis=-1)
    det = jnp.einsum('bhxd,bhyd->bhxy', q, k) * scale
    kld = -0.5 * (1.0 + logvar - jnp.log(stdvar ** 2)
                  - ((mu - det) ** 2 + jnp.exp(logvar)) / stdvar ** 2)
    nll = kld.mean(axis=(1, 2, 3))
    o = jnp.einsum('bhxy,bhyd->bhxd', att, v)
    o = o.transpose(0, 2, 1, 3).reshape(B, S, H)
    o = o @ params["w_out"] + params["b_out"]
    return o, nll


if __name__ == "__main__":
    B, S, H, num_heads = 2, 16, 32, 4
    D = H // num_heads
    stdvar = 1.0

    key = jax.random.PRNGKey(0)
    k1, k2, k3, k4, k5, k6, k7 = jax.random.split(key, 7)
    x = jax.random.normal(k1, (B, S, H), jnp.float32)
    eps = jax.random.normal(k2, (B, num_heads, S, S), jnp.float32)  # reparam noise

    params = {
        "w_qkv": jax.random.normal(k3, (H, 3 * H), jnp.float32) / jnp.sqrt(H),
        "w_mu_var": jax.random.normal(k4, (2 * D, 2), jnp.float32) / jnp.sqrt(2.0 * D),
        "b_mu_var": 0.1 * jax.random.normal(k5, (2,), jnp.float32),
        "w_out": jax.random.normal(k6, (H, H), jnp.float32) / jnp.sqrt(H),
        "b_out": 0.1 * jax.random.normal(k7, (H,), jnp.float32),
    }

    fwd = jax.jit(functools.partial(sa_block_forward, num_heads=num_heads,
                                    stdvar=stdvar))
    out, nll = fwd(x, eps, params)
    jax.block_until_ready((out, nll))

    # Tolerance accounts for bf16 MXU operands (f32 accumulation) in the kernel.
    out_ref, nll_ref = ref_forward(x, eps, params, num_heads=num_heads, stdvar=stdvar)
    np.testing.assert_allclose(np.asarray(out), np.asarray(out_ref),
                               rtol=3e-2, atol=3e-2)
    np.testing.assert_allclose(np.asarray(nll), np.asarray(nll_ref),
                               rtol=3e-2, atol=3e-2)

    print("KERNEL_OK")
</pallas_src>

<mosaic_0001>
module attributes {stable_mosaic.version = 11 : i64} {
  func.func @_matmul_kernel(%arg0: i32, %arg1: i32, %arg2: memref<32x32xf32, #tpu.memory_space<vmem>>, %arg3: memref<32x112xf32, #tpu.memory_space<vmem>>, %arg4: memref<32x112xf32, #tpu.memory_space<vmem>>) attributes {dimension_semantics = [#tpu.dimension_semantics<parallel>, #tpu.dimension_semantics<parallel>], iteration_bounds = array<i64: 1, 1>, scalar_prefetch = 0 : i64, scratch_operands = 0 : i64, tpu.core_type = #tpu.core_type<tc>, window_params = [{transform_indices = @transform_0, window_bounds = array<i64: 32, 32>}, {transform_indices = @transform_1, window_bounds = array<i64: 32, 112>}, {transform_indices = @transform_2, window_bounds = array<i64: 32, 112>}]} {
    %c0 = arith.constant 0 : index
    %c0_0 = arith.constant 0 : index
    %0 = vector.load %arg2[%c0, %c0_0] : memref<32x32xf32, #tpu.memory_space<vmem>>, vector<32x32xf32>
    %1 = arith.truncf %0 : vector<32x32xf32> to vector<32x32xbf16>
    %c0_1 = arith.constant 0 : index
    %c0_2 = arith.constant 0 : index
    %2 = vector.load %arg3[%c0_1, %c0_2] : memref<32x112xf32, #tpu.memory_space<vmem>>, vector<32x112xf32>
    %3 = arith.truncf %2 : vector<32x112xf32> to vector<32x112xbf16>
    %cst = arith.constant dense<0.000000e+00> : vector<32x112xf32>
    %4 = tpu.matmul %1, %3, %cst {dimension_numbers = #tpu.dot_dimension_numbers<[1], [0], [0], [1], [0, 0, 1, 1], [], []>} : vector<32x32xbf16>, vector<32x112xbf16>, vector<32x112xf32> -> vector<32x112xf32>
    %c0_3 = arith.constant 0 : index
    %c0_4 = arith.constant 0 : index
    %5 = vector.load %arg4[%c0_3, %c0_4] : memref<32x112xf32, #tpu.memory_space<vmem>>, vector<32x112xf32>
    tpu.vector_store %arg4[%c0_3, %c0_4], %4 {strides = array<i32>} : memref<32x112xf32, #tpu.memory_space<vmem>>, vector<32x112xf32>,
    return
  }
  func.func @transform_0(%arg0: i32, %arg1: i32) -> (i32, i32) {
    %c0_i32 = arith.constant 0 : i32
    %c0_i32_0 = arith.constant 0 : i32
    return %arg0, %c0_i32 : i32, i32
  }
  func.func @transform_1(%arg0: i32, %arg1: i32) -> (i32, i32) {
    %c0_i32 = arith.constant 0 : i32
    %c0_i32_0 = arith.constant 0 : i32
    return %c0_i32, %arg1 : i32, i32
  }
  func.func @transform_2(%arg0: i32, %arg1: i32) -> (i32, i32) {
    %c0_i32 = arith.constant 0 : i32
    return %arg0, %arg1 : i32, i32
  }
}

module attributes {stable_mosaic.version = 11 : i64} {
  func.func @_sa_attention_kernel(%arg0: i32, %arg1: memref<2xf32, #tpu.memory_space<smem>>, %arg2: memref<1x4x16x8xf32, #tpu.memory_space<vmem>>, %arg3: memref<1x4x16x8xf32, #tpu.memory_space<vmem>>, %arg4: memref<1x4x16x8xf32, #tpu.memory_space<vmem>>, %arg5: memref<1x4x16x16xf32, #tpu.memory_space<vmem>>, %arg6: memref<1x4x16x2xf32, #tpu.memory_space<vmem>>, %arg7: memref<1x4x2x16xf32, #tpu.memory_space<vmem>>, %arg8: memref<4x8x32xf32, #tpu.memory_space<vmem>>, %arg9: memref<1x32xf32, #tpu.memory_space<vmem>>, %arg10: memref<1x16x32xf32, #tpu.memory_space<vmem>>, %arg11: memref<1x1x1xf32, #tpu.memory_space<vmem>>) attributes {dimension_semantics = [#tpu.dimension_semantics<parallel>], iteration_bounds = array<i64: 2>, scalar_prefetch = 0 : i64, scratch_operands = 0 : i64, tpu.core_type = #tpu.core_type<tc>, window_params = [{transform_indices = @transform_0, window_bounds = array<i64: 2>}, {transform_indices = @transform_1, window_bounds = array<i64: 1, 4, 16, 8>}, {transform_indices = @transform_2, window_bounds = array<i64: 1, 4, 16, 8>}, {transform_indices = @transform_3, window_bounds = array<i64: 1, 4, 16, 8>}, {transform_indices = @transform_4, window_bounds = array<i64: 1, 4, 16, 16>}, {transform_indices = @transform_5, window_bounds = array<i64: 1, 4, 16, 2>}, {transform_indices = @transform_6, window_bounds = array<i64: 1, 4, 2, 16>}, {pipeline_mode = #tpu.pipeline_mode<synchronous>, transform_indices = @transform_7, window_bounds = array<i64: 4, 8, 32>}, {pipeline_mode = #tpu.pipeline_mode<synchronous>, transform_indices = @transform_8, window_bounds = array<i64: 1, 32>}, {transform_indices = @transform_9, window_bounds = array<i64: 1, 16, 32>}, {transform_indices = @transform_10, window_bounds = array<i64: 1, 1, 1>}]} {
    %c0 = arith.constant 0 : index
    %c0_0 = arith.constant 0 : index
    %c0_1 = arith.constant 0 : index
    %c0_2 = arith.constant 0 : index
    %0 = vector.load %arg2[%c0, %c0_0, %c0_1, %c0_2] : memref<1x4x16x8xf32, #tpu.memory_space<vmem>>, vector<1x4x16x8xf32>
    %1 = vector.shape_cast %0 : vector<1x4x16x8xf32> to vector<4x16x8xf32>
    %c0_3 = arith.constant 0 : index
    %c0_4 = arith.constant 0 : index
    %c0_5 = arith.constant 0 : index
    %c0_6 = arith.constant 0 : index
    %2 = vector.load %arg3[%c0_3, %c0_4, %c0_5, %c0_6] : memref<1x4x16x8xf32, #tpu.memory_space<vmem>>, vector<1x4x16x8xf32>
    %3 = vector.shape_cast %2 : vector<1x4x16x8xf32> to vector<4x16x8xf32>
    %c0_7 = arith.constant 0 : index
    %c0_8 = arith.constant 0 : index
    %c0_9 = arith.constant 0 : index
    %c0_10 = arith.constant 0 : index
    %4 = vector.load %arg4[%c0_7, %c0_8, %c0_9, %c0_10] : memref<1x4x16x8xf32, #tpu.memory_space<vmem>>, vector<1x4x16x8xf32>
    %5 = vector.shape_cast %4 : vector<1x4x16x8xf32> to vector<4x16x8xf32>
    %c0_11 = arith.constant 0 : index
    %c0_12 = arith.constant 0 : index
    %c0_13 = arith.constant 0 : index
    %c0_14 = arith.constant 0 : index
    %6 = vector.load %arg5[%c0_11, %c0_12, %c0_13, %c0_14] : memref<1x4x16x16xf32, #tpu.memory_space<vmem>>, vector<1x4x16x16xf32>
    %7 = vector.shape_cast %6 : vector<1x4x16x16xf32> to vector<4x16x16xf32>
    %c0_15 = arith.constant 0 : index
    %c0_16 = arith.constant 0 : index
    %c0_17 = arith.constant 0 : index
    %c0_18 = arith.constant 0 : index
    %8 = vector.load %arg6[%c0_15, %c0_16, %c0_17, %c0_18] : memref<1x4x16x2xf32, #tpu.memory_space<vmem>>, vector<1x4x16x2xf32>
    %9 = vector.shape_cast %8 : vector<1x4x16x2xf32> to vector<4x16x2xf32>
    %c0_19 = arith.constant 0 : index
    %c0_20 = arith.constant 0 : index
    %c0_21 = arith.constant 0 : index
    %c0_22 = arith.constant 0 : index
    %10 = vector.load %arg7[%c0_19, %c0_20, %c0_21, %c0_22] : memref<1x4x2x16xf32, #tpu.memory_space<vmem>>, vector<1x4x2x16xf32>
    %11 = vector.shape_cast %10 : vector<1x4x2x16xf32> to vector<4x2x16xf32>
    %c0_23 = arith.constant 0 : index
    %12 = memref.load %arg1[%c0_23] : memref<2xf32, #tpu.memory_space<smem>>
    %c1 = arith.constant 1 : index
    %13 = memref.load %arg1[%c1] : memref<2xf32, #tpu.memory_space<smem>>
    %14 = vector.extract_strided_slice %9 {offsets = [0, 0, 0], sizes = [4, 16, 1], strides = [1, 1, 1]} : vector<4x16x2xf32> to vector<4x16x1xf32>
    %15 = vector.extract_strided_slice %11 {offsets = [0, 0, 0], sizes = [4, 1, 16], strides = [1, 1, 1]} : vector<4x2x16xf32> to vector<4x1x16xf32>
    %16 = vector.broadcast %14 : vector<4x16x1xf32> to vector<4x16x16xf32>
    %17 = vector.broadcast %15 : vector<4x1x16xf32> to vector<4x16x16xf32>
    %18 = arith.addf %16, %17 : vector<4x16x16xf32>
    %19 = vector.broadcast %12 : f32 to vector<4x16x16xf32>
    %20 = arith.addf %18, %19 : vector<4x16x16xf32>
    %21 = vector.extract_strided_slice %9 {offsets = [0, 0, 1], sizes = [4, 16, 1], strides = [1, 1, 1]} : vector<4x16x2xf32> to vector<4x16x1xf32>
    %22 = vector.extract_strided_slice %11 {offsets = [0, 1, 0], sizes = [4, 1, 16], strides = [1, 1, 1]} : vector<4x2x16xf32> to vector<4x1x16xf32>
    %23 = vector.broadcast %21 : vector<4x16x1xf32> to vector<4x16x16xf32>
    %24 = vector.broadcast %22 : vector<4x1x16xf32> to vector<4x16x16xf32>
    %25 = arith.addf %23, %24 : vector<4x16x16xf32>
    %26 = vector.broadcast %13 : f32 to vector<4x16x16xf32>
    %27 = arith.addf %25, %26 : vector<4x16x16xf32>
    %cst = arith.constant 5.000000e-01 : f32
    %28 = vector.broadcast %cst : f32 to vector<4x16x16xf32>
    %29 = arith.mulf %28, %27 : vector<4x16x16xf32>
    %30 = math.exp %29 : vector<4x16x16xf32>
    %31 = arith.mulf %7, %30 : vector<4x16x16xf32>
    %32 = arith.addf %31, %20 : vector<4x16x16xf32>
    %cst_24 = arith.constant dense<0xFF800000> : vector<4x16xf32>
    %33 = vector.multi_reduction <maximumf>, %32, %cst_24 [2] : vector<4x16x16xf32> to vector<4x16xf32>
    %34 = vector.shape_cast %33 : vector<4x16xf32> to vector<4x16x1xf32>
    %35 = vector.broadcast %34 : vector<4x16x1xf32> to vector<4x16x16xf32>
    %36 = arith.subf %32, %35 : vector<4x16x16xf32>
    %37 = math.exp %36 : vector<4x16x16xf32>
    %cst_25 = arith.constant dense<0.000000e+00> : vector<4x16xf32>
    %38 = vector.multi_reduction <add>, %37, %cst_25 [2] : vector<4x16x16xf32> to vector<4x16xf32>
    %39 = vector.shape_cast %38 : vector<4x16xf32> to vector<4x16x1xf32>
    %40 = tpu.reciprocal %39 {approx = true} : vector<4x16x1xf32> -> vector<4x16x1xf32>
    %41 = vector.broadcast %40 : vector<4x16x1xf32> to vector<4x16x16xf32>
    %42 = arith.mulf %37, %41 : vector<4x16x16xf32>
    %43 = arith.truncf %42 : vector<4x16x16xf32> to vector<4x16x16xbf16>
    %44 = arith.truncf %5 : vector<4x16x8xf32> to vector<4x16x8xbf16>
    "tpu.trace_start"() <{level = 10 : i32, message = "hxy,hyd->hxd"}> : () -> ()
    %cst_26 = arith.constant dense<0.000000e+00> : vector<4x16x8xf32>
    %45 = tpu.matmul %43, %44, %cst_26 {dimension_numbers = #tpu.dot_dimension_numbers<[2], [1], [1], [2], [0, 0, 0, 1, 1, 2], [0], [0]>} : vector<4x16x16xbf16>, vector<4x16x8xbf16>, vector<4x16x8xf32> -> vector<4x16x8xf32>
    "tpu.trace_stop"() : () -> ()
    %c0_27 = arith.constant 0 : index
    %c0_28 = arith.constant 0 : index
    %c0_29 = arith.constant 0 : index
    %46 = vector.load %arg8[%c0_27, %c0_28, %c0_29] : memref<4x8x32xf32, #tpu.memory_space<vmem>>, vector<4x8x32xf32>
    %47 = arith.truncf %46 : vector<4x8x32xf32> to vector<4x8x32xbf16>
    %c0_30 = arith.constant 0 : index
    %c0_31 = arith.constant 0 : index
    %48 = vector.load %arg9[%c0_30, %c0_31] : memref<1x32xf32, #tpu.memory_space<vmem>>, vector<1x32xf32>
    %49 = vector.extract_strided_slice %45 {offsets = [0, 0, 0], sizes = [1, 16, 8], strides = [1, 1, 1]} : vector<4x16x8xf32> to vector<1x16x8xf32>
    %50 = vector.shape_cast %49 : vector<1x16x8xf32> to vector<16x8xf32>
    %51 = arith.truncf %50 : vector<16x8xf32> to vector<16x8xbf16>
    %52 = vector.extract_strided_slice %47 {offsets = [0, 0, 0], sizes = [1, 8, 32], strides = [1, 1, 1]} : vector<4x8x32xbf16> to vector<1x8x32xbf16>
    %53 = vector.shape_cast %52 : vector<1x8x32xbf16> to vector<8x32xbf16>
    %cst_32 = arith.constant dense<0.000000e+00> : vector<16x32xf32>
    %54 = tpu.matmul %51, %53, %cst_32 {dimension_numbers = #tpu.dot_dimension_numbers<[1], [0], [0], [1], [0, 0, 1, 1], [], []>} : vector<16x8xbf16>, vector<8x32xbf16>, vector<16x32xf32> -> vector<16x32xf32>
    %55 = vector.broadcast %48 : vector<1x32xf32> to vector<16x32xf32>
    %56 = arith.addf %55, %54 : vector<16x32xf32>
    %57 = vector.extract_strided_slice %45 {offsets = [1, 0, 0], sizes = [1, 16, 8], strides = [1, 1, 1]} : vector<4x16x8xf32> to vector<1x16x8xf32>
    %58 = vector.shape_cast %57 : vector<1x16x8xf32> to vector<16x8xf32>
    %59 = arith.truncf %58 : vector<16x8xf32> to vector<16x8xbf16>
    %60 = vector.extract_strided_slice %47 {offsets = [1, 0, 0], sizes = [1, 8, 32], strides = [1, 1, 1]} : vector<4x8x32xbf16> to vector<1x8x32xbf16>
    %61 = vector.shape_cast %60 : vector<1x8x32xbf16> to vector<8x32xbf16>
    %cst_33 = arith.constant dense<0.000000e+00> : vector<16x32xf32>
    %62 = tpu.matmul %59, %61, %cst_33 {dimension_numbers = #tpu.dot_dimension_numbers<[1], [0], [0], [1], [0, 0, 1, 1], [], []>} : vector<16x8xbf16>, vector<8x32xbf16>, vector<16x32xf32> -> vector<16x32xf32>
    %63 = arith.addf %56, %62 : vector<16x32xf32>
    %64 = vector.extract_strided_slice %45 {offsets = [2, 0, 0], sizes = [1, 16, 8], strides = [1, 1, 1]} : vector<4x16x8xf32> to vector<1x16x8xf32>
    %65 = vector.shape_cast %64 : vector<1x16x8xf32> to vector<16x8xf32>
    %66 = arith.truncf %65 : vector<16x8xf32> to vector<16x8xbf16>
    %67 = vector.extract_strided_slice %47 {offsets = [2, 0, 0], sizes = [1, 8, 32], strides = [1, 1, 1]} : vector<4x8x32xbf16> to vector<1x8x32xbf16>
    %68 = vector.shape_cast %67 : vector<1x8x32xbf16> to vector<8x32xbf16>
    %cst_34 = arith.constant dense<0.000000e+00> : vector<16x32xf32>
    %69 = tpu.matmul %66, %68, %cst_34 {dimension_numbers = #tpu.dot_dimension_numbers<[1], [0], [0], [1], [0, 0, 1, 1], [], []>} : vector<16x8xbf16>, vector<8x32xbf16>, vector<16x32xf32> -> vector<16x32xf32>
    %70 = arith.addf %63, %69 : vector<16x32xf32>
    %71 = vector.extract_strided_slice %45 {offsets = [3, 0, 0], sizes = [1, 16, 8], strides = [1, 1, 1]} : vector<4x16x8xf32> to vector<1x16x8xf32>
    %72 = vector.shape_cast %71 : vector<1x16x8xf32> to vector<16x8xf32>
    %73 = arith.truncf %72 : vector<16x8xf32> to vector<16x8xbf16>
    %74 = vector.extract_strided_slice %47 {offsets = [3, 0, 0], sizes = [1, 8, 32], strides = [1, 1, 1]} : vector<4x8x32xbf16> to vector<1x8x32xbf16>
    %75 = vector.shape_cast %74 : vector<1x8x32xbf16> to vector<8x32xbf16>
    %cst_35 = arith.constant dense<0.000000e+00> : vector<16x32xf32>
    %76 = tpu.matmul %73, %75, %cst_35 {dimension_numbers = #tpu.dot_dimension_numbers<[1], [0], [0], [1], [0, 0, 1, 1], [], []>} : vector<16x8xbf16>, vector<8x32xbf16>, vector<16x32xf32> -> vector<16x32xf32>
    %77 = arith.addf %70, %76 : vector<16x32xf32>
    %c0_36 = arith.constant 0 : index
    %c0_37 = arith.constant 0 : index
    %c0_38 = arith.constant 0 : index
    %78 = vector.load %arg10[%c0_36, %c0_37, %c0_38] : memref<1x16x32xf32, #tpu.memory_space<vmem>>, vector<1x16x32xf32>
    %79 = vector.shape_cast %78 : vector<1x16x32xf32> to vector<16x32xf32>
    %80 = vector.shape_cast %77 : vector<16x32xf32> to vector<1x16x32xf32>
    tpu.vector_store %arg10[%c0_36, %c0_37, %c0_38], %80 {strides = array<i32>} : memref<1x16x32xf32, #tpu.memory_space<vmem>>, vector<1x16x32xf32>,
    %81 = arith.truncf %1 : vector<4x16x8xf32> to vector<4x16x8xbf16>
    %82 = arith.truncf %3 : vector<4x16x8xf32> to vector<4x16x8xbf16>
    "tpu.trace_start"() <{level = 10 : i32, message = "hxd,hyd->hxy"}> : () -> ()
    %cst_39 = arith.constant dense<0.000000e+00> : vector<4x16x16xf32>
    %83 = tpu.matmul %81, %82, %cst_39 {dimension_numbers = #tpu.dot_dimension_numbers<[2], [2], [1], [1], [0, 0, 0, 1, 1, 1], [0], [0]>} : vector<4x16x8xbf16>, vector<4x16x8xbf16>, vector<4x16x16xf32> -> vector<4x16x16xf32>
    "tpu.trace_stop"() : () -> ()
    %cst_40 = arith.constant 0.353553385 : f32
    %84 = vector.broadcast %cst_40 : f32 to vector<4x16x16xf32>
    %85 = arith.mulf %83, %84 : vector<4x16x16xf32>
    %86 = arith.subf %20, %85 : vector<4x16x16xf32>
    %cst_41 = arith.constant 1.000000e+00 : f32
    %87 = vector.broadcast %cst_41 : f32 to vector<4x16x16xf32>
    %88 = arith.addf %87, %27 : vector<4x16x16xf32>
    %cst_42 = arith.constant 0.000000e+00 : f32
    %89 = vector.broadcast %cst_42 : f32 to vector<4x16x16xf32>
    %90 = arith.subf %88, %89 : vector<4x16x16xf32>
    %cst_43 = arith.constant -5.000000e-01 : f32
    %91 = vector.broadcast %cst_43 : f32 to vector<4x16x16xf32>
    %92 = arith.mulf %91, %90 : vector<4x16x16xf32>
    %93 = arith.mulf %86, %86 : vector<4x16x16xf32>
    %94 = arith.mulf %30, %30 : vector<4x16x16xf32>
    %95 = arith.addf %93, %94 : vector<4x16x16xf32>
    %cst_44 = arith.constant 5.000000e-01 : f32
    %96 = vector.broadcast %cst_44 : f32 to vector<4x16x16xf32>
    %97 = arith.mulf %96, %95 : vector<4x16x16xf32>
    %98 = arith.addf %92, %97 : vector<4x16x16xf32>
    %99 = vector.shape_cast %98 : vector<4x16x16xf32> to vector<1x4x16x16xf32>
    %cst_45 = arith.constant dense<0.000000e+00> : vector<1xf32>
    %100 = vector.multi_reduction <add>, %99, %cst_45 [1, 2, 3] : vector<1x4x16x16xf32> to vector<1xf32>
    %101 = vector.shape_cast %100 : vector<1xf32> to vector<1x1x1x1xf32>
    %102 = vector.extract %101[0, 0, 0, 0] : f32 from vector<1x1x1x1xf32>
    %cst_46 = arith.constant 9.765625E-4 : f32
    %103 = arith.mulf %102, %cst_46 : f32
    %104 = vector.broadcast %103 : f32 to vector<1x1x1xf32>
    %c0_47 = arith.constant 0 : index
    %c0_48 = arith.constant 0 : index
    %c0_49 = arith.constant 0 : index
    %105 = vector.load %arg11[%c0_47, %c0_48, %c0_49] : memref<1x1x1xf32, #tpu.memory_space<vmem>>, vector<1x1x1xf32>
    tpu.vector_store %arg11[%c0_47, %c0_48, %c0_49], %104 {strides = array<i32>} : memref<1x1x1xf32, #tpu.memory_space<vmem>>, vector<1x1x1xf32>,
    return
  }
  func.func @transform_0(%arg0: i32) -> i32 {
    %c0_i32 = arith.constant 0 : i32
    %c0_i32_0 = arith.constant 0 : i32
    return %c0_i32 : i32
  }
  func.func @transform_1(%arg0: i32) -> (i32, i32, i32, i32) {
    %c0_i32 = arith.constant 0 : i32
    %c0_i32_0 = arith.constant 0 : i32
    %c0_i32_1 = arith.constant 0 : i32
    %c0_i32_2 = arith.constant 0 : i32
    return %arg0, %c0_i32, %c0_i32_0, %c0_i32_1 : i32, i32, i32, i32
  }
  func.func @transform_2(%arg0: i32) -> (i32, i32, i32, i32) {
    %c0_i32 = arith.constant 0 : i32
    %c0_i32_0 = arith.constant 0 : i32
    %c0_i32_1 = arith.constant 0 : i32
    %c0_i32_2 = arith.constant 0 : i32
    return %arg0, %c0_i32, %c0_i32_0, %c0_i32_1 : i32, i32, i32, i32
  }
  func.func @transform_3(%arg0: i32) -> (i32, i32, i32, i32) {
    %c0_i32 = arith.constant 0 : i32
    %c0_i32_0 = arith.constant 0 : i32
    %c0_i32_1 = arith.constant 0 : i32
    %c0_i32_2 = arith.constant 0 : i32
    return %arg0, %c0_i32, %c0_i32_0, %c0_i32_1 : i32, i32, i32, i32
  }
  func.func @transform_4(%arg0: i32) -> (i32, i32, i32, i32) {
    %c0_i32 = arith.constant 0 : i32
    %c0_i32_0 = arith.constant 0 : i32
    %c0_i32_1 = arith.constant 0 : i32
    %c0_i32_2 = arith.constant 0 : i32
    return %arg0, %c0_i32, %c0_i32_0, %c0_i32_1 : i32, i32, i32, i32
  }
  func.func @transform_5(%arg0: i32) -> (i32, i32, i32, i32) {
    %c0_i32 = arith.constant 0 : i32
    %c0_i32_0 = arith.constant 0 : i32
    %c0_i32_1 = arith.constant 0 : i32
    %c0_i32_2 = arith.constant 0 : i32
    return %arg0, %c0_i32, %c0_i32_0, %c0_i32_1 : i32, i32, i32, i32
  }
  func.func @transform_6(%arg0: i32) -> (i32, i32, i32, i32) {
    %c0_i32 = arith.constant 0 : i32
    %c0_i32_0 = arith.constant 0 : i32
    %c0_i32_1 = arith.constant 0 : i32
    %c0_i32_2 = arith.constant 0 : i32
    return %arg0, %c0_i32, %c0_i32_0, %c0_i32_1 : i32, i32, i32, i32
  }
  func.func @transform_7(%arg0: i32) -> (i32, i32, i32) {
    %c0_i32 = arith.constant 0 : i32
    %c0_i32_0 = arith.constant 0 : i32
    %c0_i32_1 = arith.constant 0 : i32
    %c0_i32_2 = arith.constant 0 : i32
    return %c0_i32, %c0_i32_0, %c0_i32_1 : i32, i32, i32
  }
  func.func @transform_8(%arg0: i32) -> (i32, i32) {
    %c0_i32 = arith.constant 0 : i32
    %c0_i32_0 = arith.constant 0 : i32
    %c0_i32_1 = arith.constant 0 : i32
    return %c0_i32, %c0_i32_0 : i32, i32
  }
  func.func @transform_9(%arg0: i32) -> (i32, i32, i32) {
    %c0_i32 = arith.constant 0 : i32
    %c0_i32_0 = arith.constant 0 : i32
    %c0_i32_1 = arith.constant 0 : i32
    return %arg0, %c0_i32, %c0_i32_0 : i32, i32, i32
  }
  func.func @transform_10(%arg0: i32) -> (i32, i32, i32) {
    %c0_i32 = arith.constant 0 : i32
    %c0_i32_0 = arith.constant 0 : i32
    %c0_i32_1 = arith.constant 0 : i32
    return %arg0, %c0_i32, %c0_i32_0 : i32, i32, i32
  }
}

</mosaic_0001>

<bundles_post_ra>
// kernel: sa_block_forward.2
= control target key start
LH: loop header
LB: loop body
LE: loop exit
PB: predicated region body
PF: predicated region fallthrough
CT: control target
= control target key end

     0   :  { %vm24_vm0 = vcmask 261120   ;;  %vm80_vm1 = vcmask 916480   ;;  %s154_s1 = inlined_call_operand.vmem [shape: f32[32,112], index: 1, kind: input, shape index: {}]   ;;  %s155_s0 = inlined_call_operand.vmem [shape: f32[32,32], index: 0, kind: input, shape index: {}]   ;;  %s156_s2 = inlined_call_operand.vmem [shape: f32[32,112], index: 2, kind: output, shape index: {}]  }
   0x1   :  { %v18_v0 = vld [vmem:[%s154_s1] sm:$0xff]  ;;  %v19_v1 = vld [vmem:[%s154_s1 + $0x8] sm:$0xff]  ;;  %v20_v2 = vld [vmem:[%s154_s1 + $0x10] sm:$0xff] }
   0x2   :  { %v22_v3 = vpack.c.bf16 %v19_v1, %v18_v0  ;;  %v21_v4 = vld [vmem:[%s154_s1 + $0x18] sm:$0xff]  ;;  %v12_v5 = vld [vmem:[%s155_s0] sm:$0xff]  ;;  %v13_v6 = vld [vmem:[%s155_s0 + $0x8] sm:$0xff] }
   0x3   :  { %v23_v7 = vpack.c.bf16 %v21_v4, %v20_v2  ;;  %v16_v8 = vpack.c.bf16 %v13_v6, %v12_v5  ;;  %v14_v9 = vld [vmem:[%s155_s0 + $0x10] sm:$0xff]  ;;  %v15_v10 = vld [vmem:[%s155_s0 + $0x18] sm:$0xff] }
   0x4   :  { %95 = vmatprep.subr.bf16.mxu0 %v22_v3  ;;  %v17_v11 = vpack.c.bf16 %v15_v10, %v14_v9 }
   0x5   :  { %96 = vmatpush3.bf16.msra.mxu0 %v22_v3  ;;  %99 = vmatprep.mubr.msk.bf16.mxu0 %vm24_vm0, %v16_v8 }
   0x6   :  { %97 = vmatprep.subr.bf16.mxu0 %v23_v7 }
   0x9   :  { %98 = vmatpush3.bf16.msra.mxu0 %v23_v7 }
   0xc   :  { %100 = vmatmul.mubr.msk.bf16.vlgmr.msra.gmra.mrb[0].mxu0 %vm24_vm0, %v17_v11 }
  0xdf   :  { %v101_v12 = vpop.f32.mrb[0].mxu0 }
  0xe0   :  { %83 = vst.msk [vmem:[%s156_s2 + $0x10] sm:$0xff] %vm80_vm1, %v101_v12  ;;  %v65_v13 = vpop.f32.mrb[1].mxu0 }
  0xe1   :  { %81 = vst.msk [vmem:[%s156_s2] sm:$0xff] %vm80_vm1, %v65_v13  ;;  %v102_v14 = vpop.f32.mrb[2].mxu0 }
  0xe2   :  { %84 = vst.msk [vmem:[%s156_s2 + $0x18] sm:$0xff] %vm80_vm1, %v102_v14  ;;  %v68_v15 = vpop.f32.mrb[3].mxu0 }
  0xe3   :  { %82 = vst.msk [vmem:[%s156_s2 + $0x8] sm:$0xff] %vm80_vm1, %v68_v15 }

// kernel: sa_block_forward.3
= control target key start
LH: loop header
LB: loop body
LE: loop exit
PB: predicated region body
PF: predicated region fallthrough
CT: control target
= control target key end

     0   :  { %s3499_s0 = inlined_call_operand.hbm [shape: f32[2], index: 0, kind: input, shape index: {}]   ;;  %s3500_s1 = inlined_call_operand.hbm [shape: f32[2,4,16,8], index: 1, kind: input, shape index: {}]   ;;  %s3501_s2 = inlined_call_operand.hbm [shape: f32[2,4,16,8], index: 2, kind: input, shape index: {}]   ;;  %s3502_s3 = inlined_call_operand.hbm [shape: f32[2,4,16,8], index: 3, kind: input, shape index: {}]   ;;  %s3503_s4 = inlined_call_operand.hbm [shape: f32[2,4,16,16], index: 4, kind: input, shape index: {}]   ;;  %s3504_s5 = inlined_call_operand.hbm [shape: f32[2,4,16,2], index: 5, kind: input, shape index: {}]   ;;  %s3505_s6 = inlined_call_operand.hbm [shape: f32[2,4,2,16], index: 6, kind: input, shape index: {}]   ;;  %s3506_s7 = inlined_call_operand.hbm [shape: f32[4,8,32], index: 7, kind: input, shape index: {}]   ;;  %s3507_s8 = inlined_call_operand.hbm [shape: f32[1,32], index: 8, kind: input, shape index: {}]   ;;  %s3508_s9 = inlined_call_operand.hbm [shape: f32[2,16,32], index: 9, kind: output, shape index: {0}]   ;;  %s3509_s10 = inlined_call_operand.hbm [shape: f32[2,1,1], index: 10, kind: output, shape index: {1}]  }
   0x1   :  { %3539 = sst [smem:[#allocation38_spill]] %s3501_s2 }
   0x2   :  { %3540 = sst [smem:[#allocation39_spill]] %s3503_s4 }
   0x3   :  { %3541 = sst [smem:[#allocation40_spill]] %s3506_s7 }
   0x4   :  { %3542 = sst [smem:[#allocation41_spill]] %s3508_s9 }
   0x5   :  { %3543 = sst [smem:[#allocation42_spill]] %s3509_s10 }
   0x6   :  { %16 = vsyncpa [#allocation5], 0 }
   0x7   :  { %17 = vsyncpa [#allocation3], 0 }
   0x8   :  { %19 = vsyncpa [#allocation3 + $0x1], 0 }
   0x9   :  { %20 = vsyncpa [#allocation8], 0 }
   0xa   :  { %22 = vsyncpa [#allocation8 + $0x1], 0 }
   0xb   :  { %23 = vsyncpa [#allocation11], 0 }
   0xc   :  { %25 = vsyncpa [#allocation11 + $0x1], 0 }
   0xd   :  { %26 = vsyncpa [#allocation14], 0 }
   0xe   :  { %28 = vsyncpa [#allocation14 + $0x1], 0 }
   0xf   :  { %29 = vsyncpa [#allocation17], 0 }
  0x10   :  { %30 = vsyncpa [#allocation4], 0 }
  0x11   :  { %32 = vsyncpa [#allocation4 + $0x1], 0 }
  0x12   :  { %33 = vsyncpa [#allocation20], 0 }
  0x13   :  { %35 = vsyncpa [#allocation20 + $0x1], 0  ;;  %s2706_s13 = smov 0   ;;  %s2708_s14 = smov 0  }
  0x14   :  { %s2710_s15 = smov 0   ;;  %s2712_s16 = smov 0  }
  0x15 LB: > { %3544 = sst [smem:[#allocation30_spill]] %s2616_s13  ;;  %s2727_s17 = sadd.s32 4294967295, %s2628_s16   ;;  %s2628_s16 = sphi %s2712_s16, %s3594_s16   ;;  %s2624_s15 = sphi %s2710_s15, %s3597_s15   ;;  %s2620_s14 = sphi %s2708_s14, %s3596_s14   ;;  %s2616_s13 = sphi %s2706_s13, %s3595_s13  }
  0x16   : > { %3545 = sst [smem:[#allocation31_spill]] %s2620_s14  ;;  %s1907_s18 = sadd.s32 4294967294, %s2628_s16  }
  0x17   : > { %3546 = sst [smem:[#allocation32_spill]] %s2624_s15  ;;  %s2731_s19 = sadd.s32 1, %s2628_s16  }
  0x18   : > { %3547 = sst [smem:[#allocation33_spill]] %s2731_s19  ;;  %s69_s20 = sadd.s32 1, %s2624_s15 }
  0x19   : > { %s66_s21 = ssub.s32 %s2628_s16, %s2731_s19  ;;  %p76_p0 = scmp.ne.s32.totalorder %s2624_s15, %s2620_s14 }
  0x1a   : > { %p67_p1 = scmp.eq.s32.totalorder %s66_s21, 0  ;;  %p77_p2 = scmp.eq.s32.totalorder %s2628_s16, 0 }
  0x1b   : > { %p82_p3 = scmp.ne.s32.totalorder %s2620_s14, %s2616_s13  ;;  %p3514_p4 = scmp.eq.s32.totalorder %s2727_s17, 0 }
  0x1c   : > { %s2743_s22 = scalar_select %p67_p1, %s2624_s15, %s69_s20  }
  0x1d   : > { %p2745_p5 = por %p77_p2, %p76_p0  ;;  %p2751_p6 = por %p3514_p4, %p82_p3 }
  0x1e   : > { %3548 = sst [smem:[#allocation34_spill]] %s2743_s22  ;;  %p278_p7 = scmp.eq.s32.totalorder %s2727_s17, 1 }
  0x1f   : > { %s3549_s23 = scalar_select %p2745_p5, 1, 0 }
  0x20   : > { %s3550_s24 = scalar_select %p2751_p6, 1, 0 }
  0x21   : > { %p284_p8 = scmp.eq.s32.totalorder %s1907_s18, 1  ;;  %p1908_p9 = scmp.ge.s32.totalorder %s2628_s16, 1 }
  0x22   : > { %3551 = sst [smem:[#allocation35_spill]] %s3550_s24  ;;  %p317_p10 = scmp.lt.s32.totalorder %s2628_s16, 3 }
  0x23   : > { %p2758_p11 = por %p278_p7, %p76_p0  ;;  %p2762_p12 = por %p284_p8, %p82_p3 }
  0x24   : > { %p2766_p13 = pnand %p1908_p9, %p317_p10  ;;  %s2630_s28 = smov [#allocation15]  }
  0x25   : > { %s3552_s25 = scalar_select %p2758_p11, 1, 0 }
  0x26   : > { %s3554_s26 = scalar_select %p2762_p12, 1, 0 }
  0x27   : > { %3553 = sst [smem:[#allocation36_spill]] %s3552_s25  ;;  %p2109_p1 = pneg %p2766_p13 }
  0x28   : > { %3555 = sst [smem:[#allocation37_spill]] %s3554_s26  ;;  %s338_s29 = sshll.u32 %s2630_s28, 4  ;;  %s339_s29 = int_to_ptr.vmem [resolvable:$true] %s338_s29 }
  0x29   : > { %s3556_s27 = scalar_select %p2766_p13, 1, 0 }
  0x2a   : > { %p2774_p2 = pnand %p2109_p1, %p3514_p4  ;;  %s2781_s11 = sand.u32 1, %s2624_s15  }
  0x2b   : > { %s2784_s12 = sshll.u32 %s2781_s11, 6  ;;  %s3558_s7 = sld [smem:[#allocation40_spill]] }
  0x2c   : > { %s3557_s30 = scalar_select %p2774_p2, 1, 0 }
  0x2d   : > { %p2794_p8 = pneg %p2774_p2 }
  0x2f   : > { %s3559_s19 = scalar_select %p2794_p8, 1, 0 }
  0x31   : > { %s2257_s21 = scalar_lea.hbm %s3558_s7, 512 }
  0x32   : > { %p2258_p7 = scmp.ne.s32.totalorder %s3558_s7, %s2257_s21  ;;  %p2264_p1 = scmp.lt.u32.totalorder %s2257_s21, %s3558_s7 }
  0x34   : > { %p2260_p9 = pnand %p2794_p8, %p2258_p7 }
  0x36   : > { %p2261_p10 = pneg %p2260_p9 }
  0x38   : > { %p2266_p0 = pnand %p2264_p1, %p2261_p10 }
  0x3a   : > { %2269 = shalt.err (!%p2266_p0)
}
  0x3b   : > { %s2270_s18 = scalar_lea.vmem %s339_s29, 512  ;;  %p2278_p11 = scmp.lt.s32.totalorder %s339_s29, %s339_s29 }
  0x3c   : > { %p2271_p4 = scmp.ne.s32.totalorder %s339_s29, %s2270_s18  ;;  %p2279_p6 = scmp.lt.s32.totalorder %s2270_s18, %s2270_s18 }
  0x3e   : > { %p2273_p3 = pnand %p2271_p4, %p2794_p8  ;;  %p2280_p13 = por %p2279_p6, %p2278_p11 }
  0x40   : > { %p2274_p12 = pneg %p2273_p3 }
  0x42   : > { %p2281_p5 = pnand %p2280_p13, %p2274_p12 }
  0x44   : > { %2284 = shalt.err (!%p2281_p5)
}
  0x45   : > { %s3521_s22 = smov 128   ;;  %s3523_s15 = smov 8  }
  0x46   : > { %2115 = dma.hbm_to_vmem [thread:$0]  (!%p2774_p2), %s3558_s7, 512, %s339_s29, [#allocation14], %s3521_s22, %s3521_s22, %s3523_s15  }
  0x47   : > { %p3560_p4 = scmp.ne.s32.totalorder %s3549_s23, 0  ;;  %p3561_p6 = scmp.lt.s32.totalorder %s2628_s16, 2 }
  0x48   : > { %s2822_s28 = sshll.u32 %s2628_s16, 10  ;;  %s2825_s18 = sand.u32 1, %s2628_s16  }
  0x49   : > { %p2817_p11 = pnand %p3561_p6, %p3560_p4  ;;  %s3563_s2 = sld [smem:[#allocation38_spill]] }
  0x4a   : > { %s388_s23 = scalar_lea.vmem [#allocation7], %s2784_s12 }
  0x4b   : > { %s3562_s21 = scalar_select %p2817_p11, 1, 0 }
  0x4c   : > { %s395_s29 = sshll.u32 %s388_s23, 4  ;;  %p2841_p12 = pneg %p2817_p11  ;;  %s2834_s29 = int_to_ptr.vmem [resolvable:$true] %s395_s29 }
  0x4e   : > { %s3564_s22 = scalar_select %p2841_p12, 1, 0 }
  0x4f   : > { %s2831_s9 = scalar_lea.hbm %s3563_s2, %s2822_s28  ;;  %s2290_s15 = scalar_lea.hbm %s3563_s2, 2048 }
  0x50   : > { %s2285_s20 = scalar_lea.hbm %s2831_s9, 1024  ;;  %p2291_p3 = scmp.lt.u32.totalorder %s2831_s9, %s3563_s2 }
  0x51   : > { %p2286_p5 = scmp.ne.s32.totalorder %s2831_s9, %s2285_s20  ;;  %p2292_p7 = scmp.lt.u32.totalorder %s2290_s15, %s2285_s20 }
  0x52   : > { %p2294_p10 = scmp.lt.u32.totalorder %s2285_s20, %s2831_s9 }
  0x53   : > { %p2288_p13 = pnand %p2841_p12, %p2286_p5  ;;  %p2293_p9 = por %p2292_p7, %p2291_p3 }
  0x55   : > { %p2289_p0 = pneg %p2288_p13  ;;  %p2295_p1 = por %p2294_p10, %p2293_p9 }
  0x57   : > { %p2296_p4 = pnand %p2295_p1, %p2289_p0 }
  0x59   : > { %2299 = shalt.err (!%p2296_p4)
}
  0x5a   : > { %s2300_s26 = scalar_lea.vmem %s2834_s29, 1024  ;;  %s2633_s10 = smov [#allocation7]  }
  0x5b   : > { %p2301_p6 = scmp.ne.s32.totalorder %s2834_s29, %s2300_s26  ;;  %s2305_s13 = sshll.u32 %s2633_s10, 4  ;;  %s2306_s13 = int_to_ptr.vmem [resolvable:$false] %s2305_s13 }
  0x5c   : > { %s2307_s7 = scalar_lea.vmem %s2306_s13, 2048  ;;  %p2308_p2 = scmp.lt.s32.totalorder %s2834_s29, %s2306_s13 }
  0x5d   : > { %p2303_p5 = pnand %p2301_p6, %p2841_p12  ;;  %p2309_p8 = scmp.lt.s32.totalorder %s2307_s7, %s2300_s26 }
  0x5f   : > { %p2304_p13 = pneg %p2303_p5  ;;  %p2310_p3 = por %p2309_p8, %p2308_p2 }
  0x61   : > { %p2311_p7 = pnand %p2310_p3, %p2304_p13 }
  0x63   : > { %2314 = shalt.err (!%p2311_p7)
}
  0x64   : > { %s3565_s15 = smov 8   ;;  %s3566_s20 = smov 128  }
  0x65   : > { %s3567_s23 = scalar_lea.sflag [#allocation8], %s2825_s18  ;;  %s3568_s4 = sld [smem:[#allocation39_spill]] }
  0x66   : > { %2125 = dma.hbm_to_vmem [thread:$0]  (!%p2817_p11), %s2831_s9, 1024, %s2834_s29, %s3567_s23, %s3566_s20, %s3566_s20, %s3565_s15  }
  0x67   : > { %s430_s7 = scalar_lea.vmem [#allocation10], %s2784_s12  ;;  %s3533_s25 = scalar_lea.sflag [#allocation11], %s2825_s18 }
  0x68   : > { %s437_s2 = sshll.u32 %s430_s7, 4  ;;  %s2876_s2 = int_to_ptr.vmem [resolvable:$true] %s437_s2 }
  0x6b   : > { %s2873_s26 = scalar_lea.hbm %s3568_s4, %s2822_s28  ;;  %s2320_s23 = scalar_lea.hbm %s3568_s4, 2048 }
  0x6c   : > { %s2315_s24 = scalar_lea.hbm %s2873_s26, 1024  ;;  %p2321_p9 = scmp.lt.u32.totalorder %s2873_s26, %s3568_s4 }
  0x6d   : > { %p2316_p2 = scmp.ne.s32.totalorder %s2873_s26, %s2315_s24  ;;  %p2322_p10 = scmp.lt.u32.totalorder %s2320_s23, %s2315_s24 }
  0x6e   : > { %p2324_p4 = scmp.lt.u32.totalorder %s2315_s24, %s2873_s26 }
  0x6f   : > { %p2318_p8 = pnand %p2316_p2, %p2841_p12  ;;  %p2323_p1 = por %p2322_p10, %p2321_p9 }
  0x71   : > { %p2319_p0 = pneg %p2318_p8  ;;  %p2325_p6 = por %p2324_p4, %p2323_p1 }
  0x73   : > { %p2326_p5 = pnand %p2325_p6, %p2319_p0 }
  0x75   : > { %2329 = shalt.err (!%p2326_p5)
}
  0x76   : > { %s2330_s7 = scalar_lea.vmem %s2876_s2, 1024  ;;  %s2634_s9 = smov [#allocation10]  }
  0x77   : > { %p2331_p13 = scmp.ne.s32.totalorder %s2876_s2, %s2330_s7  ;;  %s2335_s29 = sshll.u32 %s2634_s9, 4  ;;  %s2336_s29 = int_to_ptr.vmem [resolvable:$false] %s2335_s29 }
  0x78   : > { %s2337_s10 = scalar_lea.vmem %s2336_s29, 2048  ;;  %p2338_p2 = scmp.lt.s32.totalorder %s2876_s2, %s2336_s29 }
  0x79   : > { %p2333_p3 = pnand %p2331_p13, %p2841_p12  ;;  %p2339_p8 = scmp.lt.s32.totalorder %s2337_s10, %s2330_s7 }
  0x7b   : > { %p2334_p7 = pneg %p2333_p3  ;;  %p2340_p9 = por %p2339_p8, %p2338_p2 }
  0x7d   : > { %p2341_p10 = pnand %p2340_p9, %p2334_p7 }
  0x7f   : > { %2344 = shalt.err (!%p2341_p10)
}
  0x80   : > { %2131 = dma.hbm_to_vmem [thread:$0]  (!%p2817_p11), %s2873_s26, 1024, %s2876_s2, %s3533_s25, %s3566_s20, %s3566_s20, %s3565_s15  }
  0x81   : > { %s2345_s13 = scalar_lea.hbm %s3499_s0, 16  ;;  %p3569_p1 = scmp.ne.s32.totalorder %s3559_s19, 0 }
  0x82   : > { %p2346_p0 = scmp.ne.s32.totalorder %s3499_s0, %s2345_s13  ;;  %p2352_p5 = scmp.lt.u32.totalorder %s2345_s13, %s3499_s0 }
  0x84   : > { %p2348_p4 = pnand %p2346_p0, %p3569_p1 }
  0x86   : > { %p2349_p6 = pneg %p2348_p4 }
  0x88   : > { %p2354_p13 = pnand %p2352_p5, %p2349_p6 }
  0x8a   : > { %2357 = shalt.err (!%p2354_p13)
}
  0x8b   : > { %s2635_s4 = smov [#allocation2]   ;;  %p3570_p3 = scmp.ne.s32.totalorder %s3557_s30, 0 }
  0x8c   : > { %s2636_s24 = smov [#allocation16]   ;;  %s2358_s25 = scalar_lea.hbm %s3507_s8, 16 }
  0x8d   : > { %2112 = dma.hbm_to_smem (!%p3570_p3), %s3499_s0, 16, %s2635_s4, [#allocation5]  }
  0x8e   : > { %s352_s23 = sshll.u32 %s2636_s24, 4  ;;  %p2359_p7 = scmp.ne.s32.totalorder %s3507_s8, %s2358_s25  ;;  %s353_s23 = int_to_ptr.vmem [resolvable:$true] %s352_s23 }
  0x8f   : > { %p2365_p9 = scmp.lt.u32.totalorder %s2358_s25, %s3507_s8 }
  0x90   : > { %p2361_p2 = pnand %p2359_p7, %p3569_p1 }
  0x92   : > { %p2362_p8 = pneg %p2361_p2 }
  0x94   : > { %p2367_p10 = pnand %p2365_p9, %p2362_p8 }
  0x96   : > { %2370 = shalt.err (!%p2367_p10)
}
  0x97   : > { %s2371_s4 = scalar_lea.vmem %s353_s23, 16  ;;  %s2378_s2 = scalar_lea.vmem %s353_s23, 32 }
  0x98   : > { %p2372_p0 = scmp.ne.s32.totalorder %s353_s23, %s2371_s4  ;;  %p2379_p5 = scmp.lt.s32.totalorder %s353_s23, %s353_s23 }
  0x99   : > { %p2380_p13 = scmp.lt.s32.totalorder %s2378_s2, %s2371_s4 }
  0x9a   : > { %p2374_p4 = pnand %p2372_p0, %p3569_p1 }
  0x9b   : > { %p2381_p11 = por %p2380_p13, %p2379_p5 }
  0x9c   : > { %p2375_p6 = pneg %p2374_p4 }
  0x9e   : > { %p2382_p12 = pnand %p2381_p11, %p2375_p6 }
  0xa0   : > { %2385 = shalt.err (!%p2382_p12)
}
  0xa1   : > { %2118 = dma.hbm_to_vmem [thread:$0]  (!%p3570_p3), %s3507_s8, 16, %s353_s23, [#allocation17]  }
  0xa2   : > { %s2943_s24 = scalar_lea.hbm %s3500_s1, %s2822_s28  ;;  %s367_s9 = scalar_lea.vmem [#allocation6], %s2784_s12 }
  0xa3   : > { %s374_s7 = sshll.u32 %s367_s9, 4  ;;  %s364_s30 = scalar_lea.sflag [#allocation3], %s2781_s11  ;;  %s2946_s7 = int_to_ptr.vmem [resolvable:$true] %s374_s7 }
  0xa4   : > { %s2386_s29 = scalar_lea.hbm %s2943_s24, 1024  ;;  %p3571_p12 = scmp.ne.s32.totalorder %s3564_s22, 0 }
  0xa5   : > { %p2387_p11 = scmp.ne.s32.totalorder %s2943_s24, %s2386_s29  ;;  %s2391_s10 = scalar_lea.hbm %s3500_s1, 2048 }
  0xa6   : > { %p2392_p3 = scmp.lt.u32.totalorder %s2943_s24, %s3500_s1  ;;  %p2393_p2 = scmp.lt.u32.totalorder %s2391_s10, %s2386_s29 }
  0xa7   : > { %p2389_p1 = pnand %p2387_p11, %p3571_p12  ;;  %p2395_p9 = scmp.lt.u32.totalorder %s2386_s29, %s2943_s24 }
  0xa8   : > { %p2394_p8 = por %p2393_p2, %p2392_p3 }
  0xa9   : > { %p2390_p7 = pneg %p2389_p1 }
  0xaa   : > { %p2396_p10 = por %p2395_p9, %p2394_p8 }
  0xac   : > { %p2397_p0 = pnand %p2396_p10, %p2390_p7 }
  0xae   : > { %2400 = shalt.err (!%p2397_p0)
}
  0xaf   : > { %s2401_s14 = scalar_lea.vmem %s2946_s7, 1024  ;;  %s2637_s26 = smov [#allocation6]  }
  0xb0   : > { %p2402_p4 = scmp.ne.s32.totalorder %s2946_s7, %s2401_s14  ;;  %s2406_s25 = sshll.u32 %s2637_s26, 4  ;;  %s2407_s25 = int_to_ptr.vmem [resolvable:$false] %s2406_s25 }
  0xb1   : > { %s2408_s19 = scalar_lea.vmem %s2407_s25, 2048  ;;  %p2409_p13 = scmp.lt.s32.totalorder %s2946_s7, %s2407_s25 }
  0xb2   : > { %p2404_p6 = pnand %p2402_p4, %p3571_p12  ;;  %p2410_p11 = scmp.lt.s32.totalorder %s2408_s19, %s2401_s14 }
  0xb4   : > { %p2405_p5 = pneg %p2404_p6  ;;  %p2411_p1 = por %p2410_p11, %p2409_p13 }
  0xb6   : > { %p2412_p3 = pnand %p2411_p1, %p2405_p5 }
  0xb8   : > { %2415 = shalt.err (!%p2412_p3)
}
  0xb9   : > { %p3572_p7 = scmp.ne.s32.totalorder %s3562_s21, 0  ;;  %s2979_s23 = scalar_lea.hbm %s3502_s3, %s2822_s28 }
  0xba   : > { %s409_s13 = scalar_lea.vmem [#allocation9], %s2784_s12  ;;  %s2416_s4 = scalar_lea.hbm %s2979_s23, 1024 }
  0xbb   : > { %2122 = dma.hbm_to_vmem [thread:$0]  (!%p3572_p7), %s2943_s24, 1024, %s2946_s7, %s364_s30, %s3566_s20, %s3566_s20, %s3565_s15  }
  0xbc   : > { %s416_s10 = sshll.u32 %s409_s13, 4  ;;  %p2417_p2 = scmp.ne.s32.totalorder %s2979_s23, %s2416_s4  ;;  %s2982_s10 = int_to_ptr.vmem [resolvable:$true] %s416_s10 }
  0xbd   : > { %s2421_s7 = scalar_lea.hbm %s3502_s3, 2048  ;;  %p2422_p10 = scmp.lt.u32.totalorder %s2979_s23, %s3502_s3 }
  0xbe   : > { %p2419_p8 = pnand %p2417_p2, %p3571_p12  ;;  %p2423_p0 = scmp.lt.u32.totalorder %s2421_s7, %s2416_s4 }
  0xbf   : > { %p2425_p6 = scmp.lt.u32.totalorder %s2416_s4, %s2979_s23 }
  0xc0   : > { %p2420_p9 = pneg %p2419_p8  ;;  %p2424_p4 = por %p2423_p0, %p2422_p10 }
  0xc2   : > { %p2426_p5 = por %p2425_p6, %p2424_p4 }
  0xc4   : > { %p2427_p13 = pnand %p2426_p5, %p2420_p9 }
  0xc6   : > { %2430 = shalt.err (!%p2427_p13)
}
  0xc7   : > { %s2431_s26 = scalar_lea.vmem %s2982_s10, 1024  ;;  %s2638_s25 = smov [#allocation9]  }
  0xc8   : > { %p2432_p11 = scmp.ne.s32.totalorder %s2982_s10, %s2431_s26  ;;  %s2436_s19 = sshll.u32 %s2638_s25, 4  ;;  %s2437_s19 = int_to_ptr.vmem [resolvable:$false] %s2436_s19 }
  0xc9   : > { %s2438_s9 = scalar_lea.vmem %s2437_s19, 2048  ;;  %p2439_p2 = scmp.lt.s32.totalorder %s2982_s10, %s2437_s19 }
  0xca   : > { %p2434_p1 = pnand %p2432_p11, %p3571_p12  ;;  %p2440_p8 = scmp.lt.s32.totalorder %s2438_s9, %s2431_s26 }
  0xcc   : > { %p2435_p3 = pneg %p2434_p1  ;;  %p2441_p10 = por %p2440_p8, %p2439_p2 }
  0xce   : > { %p2442_p0 = pnand %p2441_p10, %p2435_p3 }
  0xd0   : > { %2445 = shalt.err (!%p2442_p0)
}
  0xd1   : > { %s3573_s29 = scalar_lea.sflag [#allocation8], %s2825_s18  ;;  %s3014_s2 = scalar_lea.hbm %s3504_s5, %s2822_s28 }
  0xd2   : > { %2128 = dma.hbm_to_vmem [thread:$0]  (!%p3572_p7), %s2979_s23, 1024, %s2982_s10, %s3573_s29, %s3566_s20, %s3566_s20, %s3565_s15  }
  0xd3   : > { %s451_s24 = scalar_lea.vmem [#allocation12], %s2784_s12  ;;  %s2446_s30 = scalar_lea.hbm %s3014_s2, 1024 }
  0xd4   : > { %s458_s7 = sshll.u32 %s451_s24, 4  ;;  %p2447_p9 = scmp.ne.s32.totalorder %s3014_s2, %s2446_s30  ;;  %s3017_s7 = int_to_ptr.vmem [resolvable:$true] %s458_s7 }
  0xd5   : > { %s2451_s10 = scalar_lea.hbm %s3504_s5, 2048  ;;  %p2452_p5 = scmp.lt.u32.totalorder %s3014_s2, %s3504_s5 }
  0xd6   : > { %p2449_p4 = pnand %p2447_p9, %p3571_p12  ;;  %p2453_p13 = scmp.lt.u32.totalorder %s2451_s10, %s2446_s30 }
  0xd7   : > { %p2455_p1 = scmp.lt.u32.totalorder %s2446_s30, %s3014_s2 }
  0xd8   : > { %p2450_p6 = pneg %p2449_p4  ;;  %p2454_p11 = por %p2453_p13, %p2452_p5 }
  0xda   : > { %p2456_p3 = por %p2455_p1, %p2454_p11 }
  0xdc   : > { %p2457_p2 = pnand %p2456_p3, %p2450_p6 }
  0xde   : > { %2460 = shalt.err (!%p2457_p2)
}
  0xdf   : > { %s2461_s12 = scalar_lea.vmem %s3017_s7, 1024  ;;  %s2639_s25 = smov [#allocation12]  }
  0xe0   : > { %p2462_p8 = scmp.ne.s32.totalorder %s3017_s7, %s2461_s12  ;;  %s2466_s19 = sshll.u32 %s2639_s25, 4  ;;  %s2467_s19 = int_to_ptr.vmem [resolvable:$false] %s2466_s19 }
  0xe1   : > { %s2468_s9 = scalar_lea.vmem %s2467_s19, 2048  ;;  %p2469_p9 = scmp.lt.s32.totalorder %s3017_s7, %s2467_s19 }
  0xe2   : > { %p2464_p10 = pnand %p2462_p8, %p3571_p12  ;;  %p2470_p4 = scmp.lt.s32.totalorder %s2468_s9, %s2461_s12 }
  0xe4   : > { %p2465_p0 = pneg %p2464_p10  ;;  %p2471_p5 = por %p2470_p4, %p2469_p9 }
  0xe6   : > { %p2472_p13 = pnand %p2471_p5, %p2465_p0 }
  0xe8   : > { %2475 = shalt.err (!%p2472_p13)
}
  0xe9   : > { %s3574_s29 = scalar_lea.sflag [#allocation11], %s2825_s18  ;;  %s1928_s13 = sshll.u32 %s2781_s11, 3 }
  0xea   : > { %2134 = dma.hbm_to_vmem [thread:$0]  (!%p3572_p7), %s3014_s2, 1024, %s3017_s7, %s3574_s29, %s3566_s20, %s3566_s20, %s3565_s15  }
  0xeb   : > { %s1967_s4 = sshll.u32 %s2628_s16, 7  ;;  %s472_s23 = scalar_lea.vmem [#allocation13], %s1928_s13 }
  0xec   : > { %s3050_s14 = scalar_lea.hbm %s3505_s6, %s1967_s4  ;;  %s479_s10 = sshll.u32 %s472_s23, 4  ;;  %s3052_s10 = int_to_ptr.vmem [resolvable:$true] %s479_s10 }
  0xed   : > { %s469_s26 = scalar_lea.sflag [#allocation14], %s2825_s18  ;;  %s2476_s28 = scalar_lea.hbm %s3050_s14, 128 }
  0xee   : > { %p2477_p6 = scmp.ne.s32.totalorder %s3050_s14, %s2476_s28  ;;  %s2481_s20 = scalar_lea.hbm %s3505_s6, 256 }
  0xef   : > { %p2482_p3 = scmp.lt.u32.totalorder %s3050_s14, %s3505_s6  ;;  %p2483_p2 = scmp.lt.u32.totalorder %s2481_s20, %s2476_s28 }
  0xf0   : > { %p2479_p11 = pnand %p2477_p6, %p3571_p12  ;;  %p2485_p10 = scmp.lt.u32.totalorder %s2476_s28, %s3050_s14 }
  0xf1   : > { %p2484_p8 = por %p2483_p2, %p2482_p3 }
  0xf2   : > { %p2480_p1 = pneg %p2479_p11 }
  0xf3   : > { %p2486_p0 = por %p2485_p10, %p2484_p8 }
  0xf5   : > { %p2487_p9 = pnand %p2486_p0, %p2480_p1 }
  0xf7   : > { %2490 = shalt.err (!%p2487_p9)
}
  0xf8   : > { %s2491_s12 = scalar_lea.vmem %s3052_s10, 128  ;;  %s2640_s25 = smov [#allocation13]  }
  0xf9   : > { %p2492_p4 = scmp.ne.s32.totalorder %s3052_s10, %s2491_s12  ;;  %s2496_s19 = sshll.u32 %s2640_s25, 4  ;;  %s2497_s19 = int_to_ptr.vmem [resolvable:$false] %s2496_s19 }
  0xfa   : > { %s2498_s9 = scalar_lea.vmem %s2497_s19, 256  ;;  %p2499_p6 = scmp.lt.s32.totalorder %s3052_s10, %s2497_s19 }
  0xfb   : > { %p2494_p5 = pnand %p2492_p4, %p3571_p12  ;;  %p2500_p11 = scmp.lt.s32.totalorder %s2498_s9, %s2491_s12 }
  0xfd   : > { %p2495_p13 = pneg %p2494_p5  ;;  %p2501_p3 = por %p2500_p11, %p2499_p6 }
  0xff   : > { %p2502_p2 = pnand %p2501_p3, %p2495_p13 }
 0x101   : > { %2505 = shalt.err (!%p2502_p2)
}
 0x102   : > { %s2641_s29 = smov 32   ;;  %s2642_s13 = smov 2  }
 0x103   : > { %2137 = dma.hbm_to_vmem [thread:$0]  (!%p3572_p7), %s3050_s14, 128, %s3052_s10, %s469_s26, %s2641_s29, %s2641_s29, %s2642_s13  }
 0x104   : > { %p3575_p12 = scmp.ne.s32.totalorder %s3556_s27, 0 }
 0x105   : > { %p3576_p1 = scmp.eq.s32.totalorder (!%p3575_p12), %s2727_s17, 0 }
 0x106   : > { %491 = sbr.rel (%p3575_p12) target bundleno = 1281 (0x501), region = 56 }
 0x10d   : > { %2579 = dma.done.wait (%p3576_p1), [#allocation5], 16   ;;  %p3577_p8 = pmov %p3576_p1 }
 0x10e   : > { %s3578_s22 = sld [smem:[#allocation31_spill]]  ;;  %s3579_s4 = sld [smem:[#allocation35_spill]] }
 0x10f   : > { %2581 = vsyncadd (%p3577_p8), [#allocation5], 4294967280 }
 0x114   : > { %s3085_s24 = sand.u32 1, %s3578_s22   ;;  %p3580_p7 = scmp.ne.s32.totalorder %s3579_s4, 0 }
 0x115   : > { %s1933_s30 = sshll.u32 %s3085_s24, 6  ;;  %s498_s23 = scalar_lea.sflag [#allocation3], %s3085_s24 }
 0x116   : > { %s3089_s21 = scalar_lea.vmem [#allocation6], %s1933_s30 }
 0x117   : > { %2583 = dma.done.wait (%p3580_p7), %s498_s23, 1024  }
 0x118   : > { %2585 = vsyncadd (%p3580_p7), %s498_s23, 4294966272  ;;  %s506_s27 = sand.u32 1, %s2727_s17   ;;  %s3096_s14 = scalar_lea.vmem [#allocation7], %s1933_s30 }
 0x119   : > { %s507_s18 = scalar_lea.sflag [#allocation8], %s506_s27 }
 0x11a   : > { %2587 = dma.done.wait (%p3580_p7), %s507_s18, 2048  }
 0x11b   : > { %2589 = vsyncadd (%p3580_p7), %s507_s18, 4294965248  ;;  %s3102_s10 = scalar_lea.vmem [#allocation9], %s1933_s30  ;;  %s525_s26 = scalar_lea.sflag [#allocation11], %s506_s27 }
 0x11c   : > { %s3104_s28 = scalar_lea.vmem [#allocation10], %s1933_s30 }
 0x11d   : > { %2591 = dma.done.wait (%p3580_p7), %s525_s26, 2048  }
 0x11e   : > { %2593 = vsyncadd (%p3580_p7), %s525_s26, 4294965248  ;;  %s1938_s11 = sshll.u32 %s3085_s24, 3  ;;  %s3111_s15 = scalar_lea.vmem [#allocation12], %s1933_s30 }
 0x11f   : > { %s543_s20 = scalar_lea.sflag [#allocation14], %s506_s27  ;;  %s3113_s2 = scalar_lea.vmem [#allocation13], %s1938_s11 }
 0x120   : > { %2595 = dma.done.wait (%p3580_p7), %s543_s20, 128  }
 0x121   : > { %2597 = vsyncadd (%p3580_p7), %s543_s20, 4294967168  ;;  %p3581_p10 = pmov %p3576_p1 }
 0x122   : > { %p3582_p0 = pmov %p3576_p1 }
 0x123   : > { %2599 = dma.done.wait (%p3581_p10), [#allocation14], 512  }
 0x124   : > { %2601 = vsyncadd (%p3582_p0), [#allocation14], 4294966784  ;;  %p3583_p9 = pmov %p3582_p0 }
 0x125   : > { %p3584_p4 = pmov %p3582_p0 }
 0x126   : > { %2603 = dma.done.wait (%p3583_p9), [#allocation17], 16  }
 0x127   : > { %2605 = vsyncadd (%p3584_p4), [#allocation17], 4294967280 }
 0x128   : > { %559 = sfence }
 0x129   : > { %v656_v0 = vld [vmem:[%s3111_s15 + $0x10] sm:$0xff]  ;;  %v654_v1 = vld [vmem:[%s3111_s15] sm:$0xff]  ;;  %v2643_v2 = vmov 1   ;;  %v657_v3 = vld [vmem:[%s3111_s15 + $0x18] sm:$0xff]  ;;  %v2644_v5 = vmov 0   ;;  %v708_v10 = vlaneseq  ;;  %s1942_s7 = sld [smem:[#allocation2 + $0x1]] }
 0x12a   : > { %2199 = vset.pattern.permute.xlu1 %v2643_v2  ;;  %2198 = vset.pattern.permute.xlu0 %v2643_v2  ;;  %v655_v4 = vld [vmem:[%s3111_s15 + $0x8] sm:$0xff]  ;;  %v658_v6 = vld [vmem:[%s3111_s15 + $0x20] sm:$0xff]  ;;  %v660_v8 = vld [vmem:[%s3111_s15 + $0x30] sm:$0xff]  ;;  %s666_s12 = sld [smem:[#allocation2]]  ;;  %vm846_vm0 = vcmask 130048   ;;  %vm2646_vm1 = vmmov 0  }
 0x12b   : > { %750 = vperm.xlu1 %2199, %v656_v0   ;;  %742 = vperm.xlu0 %2198, %v654_v1   ;;  %v659_v7 = vld [vmem:[%s3111_s15 + $0x28] sm:$0xff]  ;;  %v661_v9 = vld [vmem:[%s3111_s15 + $0x38] sm:$0xff]  ;;  %v709_v11 = vshrl.u32 %v708_v10, 7  ;;  %v646_v58 = vld [vmem:[%s3104_s28] sm:$0xff]  ;;  %vm1129_vm2 = vcmask 64512   ;;  %vm1133_vm3 = vcmask 1043456  }
 0x12c   : > { %v663_v13 = vld [vmem:[%s3113_s2 + $0x2] sm:$0x3]  ;;  %v662_v14 = vld [vmem:[%s3113_s2] sm:$0x3]  ;;  %v664_v33 = vld [vmem:[%s3113_s2 + $0x4] sm:$0x3] }
 0x12d   : > { %v775_v12 = vsub.s32 1, %v709_v11  ;;  %v3156_v39 = vsub.s32 0, %v709_v11  ;;  %v3159_v43 = vld [vmem:[%s3113_s2 + $0x6] sm:$0x3]  ;;  %s1941_s25 = sshll.u32 %s3085_s24, 4  ;;  %s3585_s29 = sld [smem:[#allocation36_spill]] }
 0x12e   : > { %s614_s19 = scalar_lea.vmem [#allocation18], %s1941_s25  ;;  %s1968_s13 = sshll.u32 %s2727_s17, 8  ;;  %vm1336_vm4 = vcmask 261120  }
 0x12f   : > { %754 = vperm.xlu1 %2199, %v657_v3   ;;  %746 = vperm.xlu0 %2198, %v655_v4   ;;  %v780_v15 = vrot.slane %v663_v13, %v775_v12  ;;  %v776_v16 = vrot.slane %v662_v14, %v775_v12  ;;  %v3137_v17 = vstv %s1942_s7  ;;  %v784_v40 = vrot.slane %v664_v33, %v775_v12  ;;  %s1653_s9 = sshll.u32 %s614_s19, 4  ;;  %s3586_s30 = sld [smem:[#allocation41_spill]]  ;;  %s3419_s9 = int_to_ptr.vmem [resolvable:$true] %s1653_s9 }
 0x130   : > { %v711_v46 = vrot.slane %v662_v14, %v3156_v39  ;;  %v788_v49 = vrot.slane %v3159_v43, %v775_v12  ;;  %v715_v53 = vrot.slane %v663_v13, %v3156_v39  ;;  %v3175_v60 = vstv %s666_s12  ;;  %v648_v13 = vld [vmem:[%s3104_s28 + $0x10] sm:$0xff]  ;;  %s2506_s27 = scalar_lea.vmem %s3419_s9, 256  ;;  %s2647_s18 = smov [#allocation18]  }
 0x131   : > { %v719_v12 = vrot.slane %v664_v33, %v3156_v39  ;;  %p2507_p5 = scmp.ne.s32.totalorder %s3419_s9, %s2506_s27 }
 0x133   : > { %2201 = vset.pattern.permute.xlu1 %v2644_v5  ;;  %2200 = vset.pattern.permute.xlu0 %v2644_v5  ;;  %p3587_p13 = scmp.ne.s32.totalorder %s3585_s29, 0 }
 0x134   : > { %675 = vperm.xlu1 %2201, %v655_v4   ;;  %670 = vperm.xlu0 %2200, %v654_v1  }
 0x135   : > { %s3424_s23 = scalar_lea.hbm %s3586_s30, %s1968_s13  ;;  %p2508_p6 = pnand %p2507_p5, %p3587_p13 }
 0x137   : > { %p2509_p11 = pneg %p2508_p6 }
 0x138   : > { %2202 = vset.pattern.permute.xlu1 %v2643_v2  ;;  %2203 = vset.pattern.permute.xlu0 %v2643_v2 }
 0x139   : > { %758 = vperm.xlu1 %2202, %v658_v6   ;;  %762 = vperm.xlu0 %2203, %v659_v7  }
 0x13d   : > { %2204 = vset.pattern.permute.xlu1 %v2644_v5  ;;  %766 = vperm.xlu0 %2203, %v660_v8  }
 0x13e   : > { %680 = vperm.xlu1 %2204, %v656_v0  }
 0x141   : > { %2206 = vset.pattern.permute.xlu0 %v2644_v5 }
 0x142   : > { %685 = vperm.xlu1 %2204, %v657_v3   ;;  %690 = vperm.xlu0 %2206, %v658_v6  }
 0x146   : > { %2205 = vset.pattern.permute.xlu1 %v2643_v2  ;;  %705 = vperm.xlu0 %2206, %v661_v9  }
 0x147   : > { %770 = vperm.xlu1 %2205, %v661_v9  }
 0x14a   : > { %2208 = vset.pattern.permute.xlu0 %v2643_v2 }
 0x14b   : > { %2207 = vset.pattern.permute.xlu1 %v2644_v5 }
 0x14c   : > { %695 = vperm.xlu1 %2207, %v659_v7   ;;  %v647_v7 = vld [vmem:[%s3104_s28 + $0x8] sm:$0xff] }
 0x150   : > { %700 = vperm.xlu1 %2207, %v660_v8   ;;  %v649_v8 = vld [vmem:[%s3104_s28 + $0x18] sm:$0xff] }
 0x1aa   : > { %v751_v18 = vpop.permute.xlu1 %750  ;;  %v743_v19 = vpop.permute.xlu0 %742 }
 0x1ab   : > { %v791_v20 = vadd.f32 %v780_v15, %v751_v18  ;;  %v789_v21 = vadd.f32 %v776_v16, %v743_v19 }
 0x1ad   : > { %v3140_v22 = vadd.f32 %v3137_v17, %v791_v20  ;;  %v3143_v23 = vadd.f32 %v3137_v17, %v789_v21 }
 0x1ae   : > { %v755_v24 = vpop.permute.xlu1 %754  ;;  %v747_v25 = vpop.permute.xlu0 %746 }
 0x1af   : > { %v808_v26 = vmul.f32 0.5, %v3140_v22  ;;  %v806_v27 = vmul.f32 0.5, %v3143_v23  ;;  %v792_v28 = vadd.f32 %v780_v15, %v755_v24  ;;  %v790_v29 = vadd.f32 %v776_v16, %v747_v25 }
 0x1b1   : > { %v814_v30 = vmul.f32 1.442695, %v806_v27  ;;  %v3148_v31 = vadd.f32 %v3137_v17, %v792_v28  ;;  %v3151_v32 = vadd.f32 %v3137_v17, %v790_v29  ;;  %v818_v34 = vmul.f32 1.442695, %v808_v26 }
 0x1b3   : > { %v676_v35 = vpop.permute.xlu1 %675  ;;  %v671_v36 = vpop.permute.xlu0 %670  ;;  %2209 = vpow2.f32 %v814_v30  ;;  %v809_v37 = vmul.f32 0.5, %v3148_v31  ;;  %v807_v38 = vmul.f32 0.5, %v3151_v32 }
 0x1b4   : > { %2211 = vpow2.f32 %v818_v34  ;;  %v724_v50 = vadd.f32 %v711_v46, %v671_v36  ;;  %v725_v61 = vadd.f32 %v711_v46, %v676_v35 }
 0x1b5   : > { %v820_v41 = vmul.f32 1.442695, %v809_v37  ;;  %v816_v42 = vmul.f32 1.442695, %v807_v38 }
 0x1b6   : > { %v3178_v63 = vadd.f32 %v3175_v60, %v724_v50  ;;  %v3196_v15 = vadd.f32 %v3175_v60, %v725_v61 }
 0x1b7   : > { %2213 = vpow2.f32 %v820_v41 }
 0x1b8   : > { %v759_v44 = vpop.permute.xlu1 %758  ;;  %v763_v45 = vpop.permute.xlu0 %762  ;;  %2215 = vpow2.f32 %v816_v42  ;;  %v651_v42 = vld [vmem:[%s3104_s28 + $0x28] sm:$0xff] }
 0x1b9   : > { %v793_v47 = vadd.f32 %v784_v40, %v759_v44  ;;  %v794_v48 = vadd.f32 %v784_v40, %v763_v45  ;;  %v650_v40 = vld [vmem:[%s3104_s28 + $0x20] sm:$0xff] }
 0x1bb   : > { %v3164_v51 = vadd.f32 %v3137_v17, %v793_v47  ;;  %v3167_v52 = vadd.f32 %v3137_v17, %v794_v48 }
 0x1bc   : > { %v767_v54 = vpop.permute.xlu0 %766 }
 0x1bd   : > { %v810_v55 = vmul.f32 0.5, %v3164_v51  ;;  %v811_v56 = vmul.f32 0.5, %v3167_v52  ;;  %v681_v57 = vpop.permute.xlu1 %680  ;;  %v3173_v59 = vpop.eup %2209  ;;  %v795_v62 = vadd.f32 %v788_v49, %v767_v54 }
 0x1be   : > { %v726_v2 = vadd.f32 %v715_v53, %v681_v57  ;;  %v830_v4 = vmul.f32 %v3173_v59, %v646_v58  ;;  %v3184_v5 = vpop.eup %2211  ;;  %v652_v57 = vld [vmem:[%s3104_s28 + $0x30] sm:$0xff] }
 0x1bf   : > { %v822_v0 = vmul.f32 1.442695, %v810_v55  ;;  %v824_v1 = vmul.f32 1.442695, %v811_v56  ;;  %v3181_v3 = vadd.f32 %v3137_v17, %v795_v62  ;;  %v832_v27 = vmul.f32 %v3184_v5, %v648_v13 }
 0x1c0   : > { %v3199_v16 = vadd.f32 %v3175_v60, %v726_v2  ;;  %v3202_v18 = vadd.f32 %v830_v4, %v3178_v63 }
 0x1c1   : > { %2217 = vpow2.f32 %v822_v0  ;;  %v686_v6 = vpop.permute.xlu1 %685  ;;  %v3188_v9 = vpop.eup %2213  ;;  %v812_v10 = vmul.f32 0.5, %v3181_v3 }
 0x1c2   : > { %2219 = vpow2.f32 %v824_v1  ;;  %v727_v11 = vadd.f32 %v715_v53, %v686_v6  ;;  %v3193_v14 = vpop.eup %2215  ;;  %v691_v19 = vpop.permute.xlu0 %690  ;;  %v833_v25 = vmul.f32 %v3188_v9, %v649_v8  ;;  %v847_v26 = vsel %vm846_vm0, %v3202_v18, -inf }
 0x1c3   : > { %v826_v20 = vmul.f32 1.442695, %v812_v10  ;;  %v831_v24 = vmul.f32 %v3193_v14, %v647_v7  ;;  %848 = vmax.xlane.f32.xlu1 %v847_v26  ;;  %v728_v30 = vadd.f32 %v719_v12, %v691_v19  ;;  %v840_v37 = vadd.f32 %v832_v27, %v3199_v16  ;;  %v653_v10 = vld [vmem:[%s3104_s28 + $0x38] sm:$0xff] }
 0x1c4   : > { %v3205_v21 = vadd.f32 %v3175_v60, %v727_v11 }
 0x1c5   : > { %2221 = vpow2.f32 %v826_v20  ;;  %v839_v29 = vadd.f32 %v831_v24, %v3196_v15  ;;  %v3222_v41 = vadd.f32 %v3175_v60, %v728_v30 }
 0x1c6   : > { %v771_v28 = vpop.permute.xlu1 %770  ;;  %v841_v33 = vadd.f32 %v833_v25, %v3205_v21  ;;  %v706_v4 = vpop.permute.xlu0 %705 }
 0x1c7   : > { %v796_v34 = vadd.f32 %v788_v49, %v771_v28  ;;  %v850_v35 = vsel %vm846_vm0, %v839_v29, -inf  ;;  %v853_v49 = vsel %vm846_vm0, %v840_v37, -inf }
 0x1c8   : > { %v856_v36 = vsel %vm846_vm0, %v841_v33, -inf  ;;  %851 = vmax.xlane.f32.xlu0 %v850_v35 }
 0x1c9   : > { %v3218_v38 = vadd.f32 %v3137_v17, %v796_v34  ;;  %857 = vmax.xlane.f32.xlu1 %v856_v36  ;;  %v723_v17 = vrot.slane %v3159_v43, %v3156_v39 }
 0x1cb   : > { %v3225_v44 = vpop.eup %2217  ;;  %v813_v45 = vmul.f32 0.5, %v3218_v38  ;;  %v696_v46 = vpop.permute.xlu1 %695  ;;  %v731_v7 = vadd.f32 %v723_v17, %v706_v4 }
 0x1cc   : > { %v3228_v47 = vpop.eup %2219  ;;  %v729_v48 = vadd.f32 %v719_v12, %v696_v46  ;;  %v834_v50 = vmul.f32 %v3225_v44, %v650_v40  ;;  %854 = vmax.xlane.f32.xlu0 %v853_v49 }
 0x1cd   : > { %v828_v53 = vmul.f32 1.442695, %v813_v45  ;;  %v835_v54 = vmul.f32 %v3228_v47, %v651_v42  ;;  %v3255_v12 = vadd.f32 %v3175_v60, %v731_v7 }
 0x1ce   : > { %v3236_v55 = vadd.f32 %v3175_v60, %v729_v48  ;;  %v842_v56 = vadd.f32 %v834_v50, %v3222_v41 }
 0x1cf   : > { %2223 = vpow2.f32 %v828_v53  ;;  %v701_v58 = vpop.permute.xlu1 %700  ;;  %v3240_v61 = vpop.eup %2221 }
 0x1d0   : > { %v730_v62 = vadd.f32 %v723_v17, %v701_v58  ;;  %v859_v39 = vsel %vm846_vm0, %v842_v56, -inf  ;;  %v843_v43 = vadd.f32 %v835_v54, %v3236_v55  ;;  %v836_v0 = vmul.f32 %v3240_v61, %v652_v57 }
 0x1d1   : > { %860 = vmax.xlane.f32.xlu0 %v859_v39 }
 0x1d2   : > { %v3246_v1 = vadd.f32 %v3175_v60, %v730_v62  ;;  %v862_v2 = vsel %vm846_vm0, %v843_v43, -inf }
 0x1d3   : > { %863 = vmax.xlane.f32.xlu1 %v862_v2 }
 0x1d4   : > { %v844_v6 = vadd.f32 %v836_v0, %v3246_v1 }
 0x1d6   : > { %v865_v8 = vsel %vm846_vm0, %v844_v6, -inf }
 0x1d7   : > { %866 = vmax.xlane.f32.xlu0 %v865_v8 }
 0x1d9   : > { %v3252_v11 = vpop.eup %2223 }
 0x1da   : > { %v837_v13 = vmul.f32 %v3252_v11, %v653_v10 }
 0x1dc   : > { %v845_v19 = vadd.f32 %v837_v13, %v3255_v12 }
 0x1de   : > { %v868_v20 = vsel %vm846_vm0, %v845_v19, -inf }
 0x1df   : > { %869 = vmax.xlane.f32.xlu1 %v868_v20 }
 0x250   : > { %v849_v24 = vpop.xlane.xlu1 %848 }
 0x251   : > { %v871_v25 = vsub.f32 %v3202_v18, %v849_v24  ;;  %v638_v24 = vld [vmem:[%s3102_s10] sm:$0xff] }
 0x253   : > { %v879_v26 = vmul.f32 1.442695, %v871_v25  ;;  %v639_v25 = vld [vmem:[%s3102_s10 + $0x8] sm:$0xff] }
 0x255   : > { %v852_v27 = vpop.xlane.xlu0 %851  ;;  %2225 = vpow2.f32 %v879_v26  ;;  %v939_v26 = vpack.c.bf16 %v639_v25, %v638_v24 }
 0x256   : > { %v872_v28 = vsub.f32 %v839_v29, %v852_v27  ;;  %v858_v30 = vpop.xlane.xlu1 %857  ;;  %v2645_v27 = vmov 0.0  }
 0x257   : > { %v874_v34 = vsub.f32 %v841_v33, %v858_v30  ;;  %1993 = vmatprep.subr.bf16.mxu0 %v2645_v27  ;;  %1999 = vmatprep.subr.bf16.mxu1 %v2645_v27  ;;  %v641_v30 = vld [vmem:[%s3102_s10 + $0x18] sm:$0xff] }
 0x258   : > { %v881_v35 = vmul.f32 1.442695, %v872_v28  ;;  %1994 = vmatpush3.bf16.msra.mxu0 %v939_v26  ;;  %v640_v28 = vld [vmem:[%s3102_s10 + $0x10] sm:$0xff]  ;;  %1995 = vmatprep.mubr.msk.bf16.mxu0 %vm2646_vm1, %v2645_v27 }
 0x259   : > { %v885_v36 = vmul.f32 1.442695, %v874_v34  ;;  %v855_v60 = vpop.xlane.xlu0 %854  ;;  %2005 = vmatprep.subr.bf16.mxu0 %v2645_v27  ;;  %v940_v34 = vpack.c.bf16 %v641_v30, %v640_v28  ;;  %2001 = vmatprep.mubr.msk.bf16.mxu1 %vm2646_vm1, %v2645_v27 }
 0x25a   : > { %2227 = vpow2.f32 %v881_v35  ;;  %v873_v40 = vsub.f32 %v840_v37, %v855_v60 }
 0x25b   : > { %2229 = vpow2.f32 %v885_v36  ;;  %2000 = vmatpush3.bf16.msra.mxu1 %v940_v34 }
 0x25c   : > { %v883_v42 = vmul.f32 1.442695, %v873_v40  ;;  %2011 = vmatprep.subr.bf16.mxu1 %v2645_v27 }
 0x25e   : > { %v861_v45 = vpop.xlane.xlu0 %860  ;;  %2231 = vpow2.f32 %v883_v42 }
 0x25f   : > { %v875_v46 = vsub.f32 %v842_v56, %v861_v45  ;;  %v3261_v18 = vpop.eup %2225 }
 0x260   : > { %v864_v48 = vpop.xlane.xlu1 %863  ;;  %v895_v33 = vsel %vm846_vm0, %v3261_v18, 0.0 }
 0x261   : > { %v887_v49 = vmul.f32 1.442695, %v875_v46  ;;  %v876_v17 = vsub.f32 %v843_v43, %v864_v48  ;;  %896 = vadd.xlane.f32.xlu0 %v895_v33  ;;  %v642_v48 = vld [vmem:[%s3102_s10 + $0x20] sm:$0xff] }
 0x263   : > { %2233 = vpow2.f32 %v887_v49  ;;  %v889_v29 = vmul.f32 1.442695, %v876_v17  ;;  %v643_v49 = vld [vmem:[%s3102_s10 + $0x28] sm:$0xff] }
 0x264   : > { %v867_v50 = vpop.xlane.xlu0 %866  ;;  %v2228_v53 = vpop.eup %2227 }
 0x265   : > { %2235 = vpow2.f32 %v889_v29  ;;  %v877_v37 = vsub.f32 %v844_v6, %v867_v50  ;;  %v898_v54 = vsel %vm846_vm0, %v2228_v53, 0.0  ;;  %v3266_v57 = vpop.eup %2229  ;;  %v941_v50 = vpack.c.bf16 %v643_v49, %v642_v48  ;;  %v635_v48 = vld [vmem:[%s3096_s14 + $0x28] sm:$0xff]  ;;  %v624_v49 = vld [vmem:[%s3089_s21 + $0x10] sm:$0xff] }
 0x266   : > { %899 = vadd.xlane.f32.xlu1 %v898_v54  ;;  %v904_v39 = vsel %vm846_vm0, %v3266_v57, 0.0 }
 0x267   : > { %v891_v56 = vmul.f32 1.442695, %v877_v37 }
 0x268   : > { %v3268_v58 = vpop.eup %2231 }
 0x269   : > { %2237 = vpow2.f32 %v891_v56  ;;  %v901_v62 = vsel %vm846_vm0, %v3268_v58, 0.0  ;;  %v644_v56 = vld [vmem:[%s3102_s10 + $0x30] sm:$0xff] }
 0x26a   : > { %902 = vadd.xlane.f32.xlu0 %v901_v62  ;;  %905 = vadd.xlane.f32.xlu1 %v904_v39  ;;  %v645_v62 = vld [vmem:[%s3102_s10 + $0x38] sm:$0xff] }
 0x26c   : > { %v870_v43 = vpop.xlane.xlu1 %869 }
 0x26d   : > { %v3274_v0 = vpop.eup %2233  ;;  %v878_v2 = vsub.f32 %v845_v19, %v870_v43 }
 0x26e   : > { %v907_v4 = vsel %vm846_vm0, %v3274_v0, 0.0 }
 0x26f   : > { %v3278_v6 = vpop.eup %2235  ;;  %v893_v7 = vmul.f32 1.442695, %v878_v2  ;;  %908 = vadd.xlane.f32.xlu0 %v907_v4 }
 0x270   : > { %v910_v8 = vsel %vm846_vm0, %v3278_v6, 0.0 }
 0x271   : > { %2239 = vpow2.f32 %v893_v7  ;;  %911 = vadd.xlane.f32.xlu1 %v910_v8  ;;  %v942_v7 = vpack.c.bf16 %v645_v62, %v644_v56  ;;  %v626_v56 = vld [vmem:[%s3089_s21 + $0x20] sm:$0xff]  ;;  %v627_v62 = vld [vmem:[%s3089_s21 + $0x28] sm:$0xff] }
 0x273   : > { %v3282_v10 = vpop.eup %2237 }
 0x274   : > { %v913_v13 = vsel %vm846_vm0, %v3282_v10, 0.0 }
 0x275   : > { %914 = vadd.xlane.f32.xlu0 %v913_v13 }
 0x27b   : > { %v3286_v19 = vpop.eup %2239 }
 0x27c   : > { %v916_v20 = vsel %vm846_vm0, %v3286_v19, 0.0 }
 0x27d   : > { %917 = vadd.xlane.f32.xlu1 %v916_v20 }
 0x2ee   : > { %v897_v35 = vpop.xlane.xlu0 %896 }
 0x2ef   : > { %2241 = vrcp.f32 %v897_v35 }
 0x2f3   : > { %v900_v36 = vpop.xlane.xlu1 %899 }
 0x2f4   : > { %2243 = vrcp.f32 %v900_v36  ;;  %v632_v36 = vld [vmem:[%s3096_s14 + $0x10] sm:$0xff] }
 0x2f7   : > { %v903_v60 = vpop.xlane.xlu0 %902  ;;  %v906_v40 = vpop.xlane.xlu1 %905 }
 0x2f8   : > { %2245 = vrcp.f32 %v903_v60  ;;  %v633_v60 = vld [vmem:[%s3096_s14 + $0x18] sm:$0xff] }
 0x2f9   : > { %2247 = vrcp.f32 %v906_v40  ;;  %v2242_v45 = vpop.eup %2241  ;;  %v622_v40 = vld [vmem:[%s3089_s21] sm:$0xff] }
 0x2fa   : > { %v927_v29 = vmul.f32 %v2242_v45, %v3261_v18 }
 0x2fc   : > { %v909_v42 = vpop.xlane.xlu0 %908 }
 0x2fd   : > { %2249 = vrcp.f32 %v909_v42  ;;  %v623_v42 = vld [vmem:[%s3089_s21 + $0x8] sm:$0xff] }
 0x2fe   : > { %v912_v46 = vpop.xlane.xlu1 %911  ;;  %v2244_v17 = vpop.eup %2243 }
 0x2ff   : > { %2251 = vrcp.f32 %v912_v46  ;;  %v928_v33 = vmul.f32 %v2244_v17, %v2228_v53  ;;  %v634_v46 = vld [vmem:[%s3096_s14 + $0x20] sm:$0xff]  ;;  %v625_v17 = vld [vmem:[%s3089_s21 + $0x18] sm:$0xff] }
 0x301   : > { %v935_v37 = vpack.c.bf16 %v928_v33, %v927_v29  ;;  %v1345_v29 = vpack.c.bf16 %v635_v48, %v634_v46  ;;  %v1340_v33 = vpack.c.bf16 %v625_v17, %v624_v49  ;;  %v1122_v49 = vld [vmem:[#allocation15 + $0x18] sm:$0xff] }
 0x302   : > { %v2246_v54 = vpop.eup %2245  ;;  %v915_v4 = vpop.xlane.xlu0 %914 }
 0x303   : > { %v2248_v39 = vpop.eup %2247  ;;  %1996 = vmatmul.mubr.msk.bf16.vlgmr.msra.gmra.mrb[0].mxu0 %vm846_vm0, %v935_v37  ;;  %v929_v43 = vmul.f32 %v2246_v54, %v3268_v58  ;;  %2253 = vrcp.f32 %v915_v4  ;;  %v636_v37 = vld [vmem:[%s3096_s14 + $0x30] sm:$0xff]  ;;  %v637_v54 = vld [vmem:[%s3096_s14 + $0x38] sm:$0xff] }
 0x304   : > { %v930_v2 = vmul.f32 %v2248_v39, %v3266_v57  ;;  %2006 = vmatpush3.bf16.msra.mxu0 %v941_v50  ;;  %2007 = vmatprep.mubr.msk.bf16.mxu0 %vm2646_vm1, %v2645_v27  ;;  %v1445_v50 = vsel %vm1129_vm2, %v1345_v29, 0  ;;  %v1346_v39 = vpack.c.bf16 %v637_v54, %v636_v37  ;;  %v628_v4 = vld [vmem:[%s3089_s21 + $0x30] sm:$0xff] }
 0x305   : > { %2017 = vmatprep.subr.bf16.mxu0 %v2645_v27 }
 0x306   : > { %v936_v53 = vpack.c.bf16 %v930_v2, %v929_v43  ;;  %v1341_v43 = vpack.c.bf16 %v627_v62, %v626_v56  ;;  %v1492_v2 = vsel %vm1129_vm2, %v1346_v39, 0 }
 0x307   : > { %v2250_v18 = vpop.eup %2249 }
 0x308   : > { %2002 = vmatmul.mubr.msk.bf16.vlgmr.msra.gmra.mrb[0].mxu1 %vm846_vm0, %v936_v53  ;;  %v931_v58 = vmul.f32 %v2250_v18, %v3274_v0  ;;  %v630_v0 = vld [vmem:[%s3096_s14] sm:$0xff]  ;;  %v1119_v53 = vld [vmem:[#allocation15] sm:$0xff] }
 0x309   : > { %v2252_v8 = vpop.eup %2251  ;;  %2012 = vmatpush3.bf16.msra.mxu1 %v942_v7  ;;  %2013 = vmatprep.mubr.msk.bf16.mxu1 %vm2646_vm1, %v2645_v27  ;;  %v629_v7 = vld [vmem:[%s3089_s21 + $0x38] sm:$0xff]  ;;  %s1636_s21 = scalar_lea.sflag [#allocation4], %s3085_s24 }
 0x30a   : > { %v932_v57 = vmul.f32 %v2252_v8, %v3278_v6  ;;  %v918_v13 = vpop.xlane.xlu1 %917  ;;  %2041 = vmatprep.subr.bf16.mxu1 %v2645_v27  ;;  %v631_v6 = vld [vmem:[%s3096_s14 + $0x8] sm:$0xff]  ;;  %v1342_v18 = vpack.c.bf16 %v629_v7, %v628_v4  ;;  %v1123_v8 = vpack.c.bf16 %v1119_v53, %v1119_v53  ;;  %v1551_v53 = vadd.f32 1.0, %v3143_v23  ;;  %s2510_s14 = sshll.u32 %s2647_s18, 4  ;;  %s2511_s14 = int_to_ptr.vmem [resolvable:$false] %s2510_s14 }
 0x30b   : > { %2255 = vrcp.f32 %v918_v13  ;;  %v1343_v25 = vpack.c.bf16 %v631_v6, %v630_v0  ;;  %s2512_s10 = scalar_lea.vmem %s2511_s14, 512  ;;  %p2513_p3 = scmp.lt.s32.totalorder %s3419_s9, %s2511_s14 }
 0x30c   : > { %v937_v20 = vpack.c.bf16 %v932_v57, %v931_v58  ;;  %v1135_v58 = vsel %vm1133_vm3, %v1123_v8, 0  ;;  %v1120_v57 = vld [vmem:[#allocation15 + $0x8] sm:$0xff]  ;;  %p2514_p2 = scmp.lt.s32.totalorder %s2512_s10, %s2506_s27 }
 0x30d   : > { %v2254_v24 = vpop.eup %2253  ;;  %v1351_v35 = vsel %vm1129_vm2, %v1343_v25, 0  ;;  %v1124_v13 = vpack.c.bf16 %v1120_v57, %v1120_v57 }
 0x30e   : > { %2008 = vmatmul.mubr.msk.bf16.vlgmr.msra.gmra.mrb[4].mxu0 %vm846_vm0, %v937_v20  ;;  %v933_v28 = vmul.f32 %v2254_v24, %v3282_v10  ;;  %v1344_v10 = vpack.c.bf16 %v633_v60, %v632_v36  ;;  %v1121_v60 = vld [vmem:[#allocation15 + $0x10] sm:$0xff]  ;;  %p2515_p12 = por %p2514_p2, %p2513_p3 }
 0x30f   : > { %2019 = vmatprep.mubr.msk.bf16.mxu0 %vm2646_vm1, %v2645_v27  ;;  %2018 = vmatpush3.bf16.msra.mxu0 %v1135_v58  ;;  %v1575_v58 = vmul.f32 %v3173_v59, %v3173_v59 }
 0x310   : > { %v1398_v45 = vsel %vm1129_vm2, %v1344_v10, 0  ;;  %2023 = vmatprep.subr.bf16.mxu0 %v2645_v27  ;;  %v1125_v10 = vpack.c.bf16 %v1121_v60, %v1121_v60  ;;  %p2516_p1 = pnand %p2515_p12, %p2509_p11 }
 0x312   : > { %v1241_v48 = vsel %vm1133_vm3, %v1125_v10, 0  ;;  %v1554_v10 = vadd.f32 1.0, %v3148_v31 }
 0x315   : > { %v2256_v26 = vpop.eup %2255 }
 0x316   : > { %v934_v30 = vmul.f32 %v2256_v26, %v3286_v19  ;;  %v1339_v19 = vpack.c.bf16 %v623_v42, %v622_v40  ;;  %v1191_v26 = vsel %vm1133_vm3, %v1124_v13, 0  ;;  %v1552_v13 = vadd.f32 1.0, %v3151_v32 }
 0x318   : > { %v938_v34 = vpack.c.bf16 %v934_v30, %v933_v28  ;;  %v1560_v23 = vmul.f32 -0.5, %v1552_v13  ;;  %v1580_v13 = vmul.f32 %v3228_v47, %v3228_v47  ;;  %v1581_v47 = vmul.f32 %v3240_v61, %v3240_v61 }
 0x31a   : > { %2014 = vmatmul.mubr.msk.bf16.vlgmr.msra.gmra.mrb[4].mxu1 %vm846_vm0, %v938_v34 }
 0x31b   : > { %2042 = vmatpush3.bf16.xpose.msra.mxu1 %v1351_v35  ;;  %2043 = vmatprep.mubr.msk.bf16.mxu1 %vm2646_vm1, %v2645_v27 }
 0x31c   : > { %2047 = vmatprep.subr.bf16.mxu1 %v2645_v27 }
 0x322   : > { %2044 = vmatmul.mubr.msk.bf16.vlgmr.msra.gmra.mrb[8].mxu1 %vm1129_vm2, %v1339_v19 }
 0x323   : > { %2048 = vmatpush3.bf16.xpose.msra.mxu1 %v1398_v45  ;;  %2049 = vmatprep.mubr.msk.bf16.mxu1 %vm2646_vm1, %v2645_v27 }
 0x324   : > { %2053 = vmatprep.subr.bf16.mxu1 %v2645_v27 }
 0x32a   : > { %2050 = vmatmul.mubr.msk.bf16.vlgmr.msra.gmra.mrb[12].mxu1 %vm1129_vm2, %v1340_v33  ;;  %v1126_v33 = vpack.c.bf16 %v1122_v49, %v1122_v49 }
 0x32b   : > { %2054 = vmatpush3.bf16.xpose.msra.mxu1 %v1445_v50  ;;  %2055 = vmatprep.mubr.msk.bf16.mxu1 %vm2646_vm1, %v2645_v27 }
 0x32c   : > { %2059 = vmatprep.subr.bf16.mxu1 %v2645_v27  ;;  %v1291_v56 = vsel %vm1133_vm3, %v1126_v33, 0 }
 0x332   : > { %2056 = vmatmul.mubr.msk.bf16.vlgmr.msra.gmra.mrb[16].mxu1 %vm1129_vm2, %v1341_v43 }
 0x333   : > { %2060 = vmatpush3.bf16.xpose.msra.mxu1 %v1492_v2  ;;  %2061 = vmatprep.mubr.msk.bf16.mxu1 %vm2646_vm1, %v2645_v27 }
 0x33a   : > { %2062 = vmatmul.mubr.msk.bf16.vlgmr.msra.gmra.mrb[20].mxu1 %vm1129_vm2, %v1342_v18 }
 0x3d6   : > { %v980_v20 = vpop.f32.mrb[0].mxu0 }
 0x3d7   : > { %v1997_v0 = vpop.f32.mrb[1].mxu0 }
 0x3d8   : > { %v983_v6 = vpop.f32.mrb[2].mxu0 }
 0x3d9   : > { %v1128_v24 = vpack.c.bf16 %v983_v6, %v980_v20  ;;  %v1998_v25 = vpop.f32.mrb[3].mxu0 }
 0x3db   : > { %v1024_v28 = vpop.f32.mrb[0].mxu1  ;;  %2020 = vmatmul.mubr.msk.bf16.vlgmr.msra.gmra.mrb[8].mxu0 %vm1129_vm2, %v1128_v24  ;;  %v1559_v24 = vmul.f32 -0.5, %v1551_v53  ;;  %v1556_v53 = vadd.f32 1.0, %v3167_v52 }
 0x3dc   : > { %v2003_v30 = vpop.f32.mrb[1].mxu1  ;;  %2024 = vmatpush3.bf16.msra.mxu0 %v1191_v26  ;;  %2025 = vmatprep.mubr.msk.bf16.mxu0 %vm2646_vm1, %v2645_v27 }
 0x3dd   : > { %v1027_v34 = vpop.f32.mrb[2].mxu1  ;;  %2029 = vmatprep.subr.bf16.mxu0 %v2645_v27 }
 0x3de   : > { %v1186_v35 = vpack.c.bf16 %v1027_v34, %v1024_v28  ;;  %v2004_v36 = vpop.f32.mrb[3].mxu1 }
 0x3df   : > { %v1553_v36 = vadd.f32 1.0, %v3140_v22 }
 0x3e1   : > { %v1068_v40 = vpop.f32.mrb[4].mxu0 }
 0x3e2   : > { %v2009_v42 = vpop.f32.mrb[5].mxu0 }
 0x3e3   : > { %v1071_v19 = vpop.f32.mrb[6].mxu0 }
 0x3e4   : > { %v1236_v45 = vpack.c.bf16 %v1071_v19, %v1068_v40  ;;  %v2010_v46 = vpop.f32.mrb[7].mxu0  ;;  %v1577_v40 = vmul.f32 %v3184_v5, %v3184_v5  ;;  %v1578_v19 = vmul.f32 %v3188_v9, %v3188_v9 }
 0x3e7   : > { %2026 = vmatmul.mubr.msk.bf16.vlgmr.msra.gmra.mrb[8].mxu0 %vm1129_vm2, %v1186_v35 }
 0x3e8   : > { %2030 = vmatpush3.bf16.msra.mxu0 %v1241_v48  ;;  %2031 = vmatprep.mubr.msk.bf16.mxu0 %vm2646_vm1, %v2645_v27 }
 0x3e9   : > { %2035 = vmatprep.subr.bf16.mxu0 %v2645_v27 }
 0x3ed   : > { %v1112_v17 = vpop.f32.mrb[4].mxu1 }
 0x3ee   : > { %v2015_v29 = vpop.f32.mrb[5].mxu1 }
 0x3ef   : > { %v1115_v50 = vpop.f32.mrb[6].mxu1 }
 0x3f0   : > { %v1286_v37 = vpack.c.bf16 %v1115_v50, %v1112_v17  ;;  %v2016_v54 = vpop.f32.mrb[7].mxu1  ;;  %v1561_v17 = vmul.f32 -0.5, %v1553_v36 }
 0x3f3   : > { %2032 = vmatmul.mubr.msk.bf16.vlgmr.msra.gmra.mrb[8].mxu0 %vm1129_vm2, %v1236_v45 }
 0x3f4   : > { %2036 = vmatpush3.bf16.msra.mxu0 %v1291_v56  ;;  %2037 = vmatprep.mubr.msk.bf16.mxu0 %vm2646_vm1, %v2645_v27  ;;  %v1576_v27 = vmul.f32 %v3193_v14, %v3193_v14 }
 0x3f5   : > { %v1387_v62 = vpop.f32.mrb[8].mxu1 }
 0x3f6   : > { %v1535_v39 = vmul.f32 0.35355338, %v1387_v62  ;;  %v2045_v43 = vpop.f32.mrb[9].mxu1 }
 0x3f7   : > { %v1390_v2 = vpop.f32.mrb[10].mxu1  ;;  %v1579_v43 = vmul.f32 %v3225_v44, %v3225_v44 }
 0x3f8   : > { %v1543_v4 = vsub.f32 %v3178_v63, %v1535_v39  ;;  %v1536_v7 = vmul.f32 0.35355338, %v1390_v2  ;;  %v2046_v18 = vpop.f32.mrb[11].mxu1  ;;  %v1555_v39 = vadd.f32 1.0, %v3164_v51 }
 0x3fa   : > { %v1567_v8 = vmul.f32 %v1543_v4, %v1543_v4  ;;  %v1544_v57 = vsub.f32 %v3196_v15, %v1536_v7 }
 0x3fc   : > { %v1583_v20 = vadd.f32 %v1575_v58, %v1567_v8  ;;  %v1568_v0 = vmul.f32 %v1544_v57, %v1544_v57 }
 0x3fd   : > { %v1434_v6 = vpop.f32.mrb[12].mxu1 }
 0x3fe   : > { %v1591_v63 = vmul.f32 0.5, %v1583_v20  ;;  %v1584_v25 = vadd.f32 %v1576_v27, %v1568_v0  ;;  %v1537_v26 = vmul.f32 0.35355338, %v1434_v6  ;;  %v2051_v28 = vpop.f32.mrb[13].mxu1  ;;  %v1563_v0 = vmul.f32 -0.5, %v1555_v39 }
 0x3ff   : > { %v1437_v30 = vpop.f32.mrb[14].mxu1  ;;  %2038 = vmatmul.mubr.msk.bf16.vlgmr.msra.gmra.mrb[8].mxu0 %vm1129_vm2, %v1286_v37  ;;  %v1562_v37 = vmul.f32 -0.5, %v1554_v10 }
 0x400   : > { %v1599_v34 = vadd.f32 %v1591_v63, %v1559_v24  ;;  %v1592_v35 = vmul.f32 0.5, %v1584_v25  ;;  %v1545_v59 = vsub.f32 %v3199_v16, %v1537_v26  ;;  %v1538_v32 = vmul.f32 0.35355338, %v1437_v30  ;;  %v2052_v15 = vpop.f32.mrb[15].mxu1 }
 0x401   : > { %v1564_v63 = vmul.f32 -0.5, %v1556_v53  ;;  %v1557_v30 = vadd.f32 1.0, %v3181_v3  ;;  %v1558_v15 = vadd.f32 1.0, %v3218_v38 }
 0x402   : > { %v1600_v60 = vadd.f32 %v1592_v35, %v1560_v23  ;;  %v1569_v14 = vmul.f32 %v1545_v59, %v1545_v59  ;;  %v1546_v42 = vsub.f32 %v3205_v21, %v1538_v32  ;;  %v1607_v16 = vsel %vm846_vm0, %v1599_v34, 0.0 }
 0x404   : > { %v1608_v45 = vsel %vm846_vm0, %v1600_v60, 0.0  ;;  %v1585_v46 = vadd.f32 %v1577_v40, %v1569_v14  ;;  %v1570_v48 = vmul.f32 %v1546_v42, %v1546_v42  ;;  %v1565_v42 = vmul.f32 -0.5, %v1557_v30 }
 0x405   : > { %v1609_v49 = vadd.f32 %v1608_v45, %v1607_v16  ;;  %v1481_v22 = vpop.f32.mrb[16].mxu1 }
 0x406   : > { %v1593_v29 = vmul.f32 0.5, %v1585_v46  ;;  %v1586_v33 = vadd.f32 %v1578_v19, %v1570_v48  ;;  %v1539_v50 = vmul.f32 0.35355338, %v1481_v22  ;;  %v2057_v5 = vpop.f32.mrb[17].mxu1  ;;  %v1566_v19 = vmul.f32 -0.5, %v1558_v15 }
 0x407   : > { %v1484_v21 = vpop.f32.mrb[18].mxu1 }
 0x408   : > { %v1601_v54 = vadd.f32 %v1593_v29, %v1561_v17  ;;  %v1594_v31 = vmul.f32 0.5, %v1586_v33  ;;  %v1547_v56 = vsub.f32 %v3222_v41, %v1539_v50  ;;  %v1540_v9 = vmul.f32 0.35355338, %v1484_v21  ;;  %v2058_v62 = vpop.f32.mrb[19].mxu1 }
 0x40a   : > { %v1610_v2 = vsel %vm846_vm0, %v1601_v54, 0.0  ;;  %v1602_v4 = vadd.f32 %v1594_v31, %v1562_v37  ;;  %v1571_v7 = vmul.f32 %v1547_v56, %v1547_v56  ;;  %v1548_v18 = vsub.f32 %v3236_v55, %v1540_v9  ;;  %v1948_v37 = vld [vmem:[#allocation16] ss:$0 sm:$0xff] }
 0x40b   : > { %v1611_v8 = vadd.f32 %v1610_v2, %v1609_v49 }
 0x40c   : > { %v1612_v58 = vsel %vm846_vm0, %v1602_v4, 0.0  ;;  %v1587_v57 = vadd.f32 %v1579_v43, %v1571_v7  ;;  %v1572_v41 = vmul.f32 %v1548_v18, %v1548_v18 }
 0x40d   : > { %v1528_v51 = vpop.f32.mrb[20].mxu1  ;;  %v1613_v20 = vadd.f32 %v1612_v58, %v1611_v8 }
 0x40e   : > { %v1595_v44 = vmul.f32 0.5, %v1587_v57  ;;  %v1588_v27 = vadd.f32 %v1580_v13, %v1572_v41  ;;  %v1541_v6 = vmul.f32 0.35355338, %v1528_v51  ;;  %v2063_v24 = vpop.f32.mrb[21].mxu1 }
 0x40f   : > { %v1531_v25 = vpop.f32.mrb[22].mxu1 }
 0x410   : > { %v1603_v55 = vadd.f32 %v1595_v44, %v1563_v0  ;;  %v1596_v26 = vmul.f32 0.5, %v1588_v27  ;;  %v1549_v52 = vsub.f32 %v3246_v1, %v1541_v6  ;;  %v1542_v28 = vmul.f32 0.35355338, %v1531_v25  ;;  %v2064_v23 = vpop.f32.mrb[23].mxu1 }
 0x411   : > { %v1582_v1 = vmul.f32 %v3252_v11, %v3252_v11 }
 0x412   : > { %v1604_v34 = vadd.f32 %v1596_v26, %v1564_v63  ;;  %v1573_v35 = vmul.f32 %v1549_v52, %v1549_v52  ;;  %v1550_v59 = vsub.f32 %v3255_v12, %v1542_v28  ;;  %v1614_v32 = vsel %vm846_vm0, %v1603_v55, 0.0 }
 0x413   : > { %v1615_v36 = vadd.f32 %v1614_v32, %v1613_v20 }
 0x414   : > { %v1589_v60 = vadd.f32 %v1581_v47, %v1573_v35  ;;  %v1574_v14 = vmul.f32 %v1550_v59, %v1550_v59  ;;  %v1616_v40 = vsel %vm846_vm0, %v1604_v34, 0.0 }
 0x415   : > { %v1617_v3 = vadd.f32 %v1616_v40, %v1615_v36 }
 0x416   : > { %v1597_v10 = vmul.f32 0.5, %v1589_v60  ;;  %v1590_v61 = vadd.f32 %v1582_v1, %v1574_v14 }
 0x418   : > { %v1598_v16 = vmul.f32 0.5, %v1590_v61  ;;  %v1605_v12 = vadd.f32 %v1597_v10, %v1565_v42 }
 0x41a   : > { %v1606_v45 = vadd.f32 %v1598_v16, %v1566_v19  ;;  %v1618_v46 = vsel %vm846_vm0, %v1605_v12, 0.0 }
 0x41b   : > { %v1619_v38 = vadd.f32 %v1618_v46, %v1617_v3 }
 0x41c   : > { %v1620_v48 = vsel %vm846_vm0, %v1606_v45, 0.0 }
 0x41d   : > { %v1621_v49 = vadd.f32 %v1620_v48, %v1619_v38 }
 0x41f   : > { %1622 = vadd.xlane.f32.xlu0 %v1621_v49 }
 0x4ac   : > { %v1623_v11 = vpop.xlane.xlu0 %1622 }
 0x4ad   : > { %v1624_v22 = vrot.slane %v1623_v11, 4 }
 0x4af   : > { %v1625_v17 = vadd.f32 %v1624_v22, %v1623_v11 }
 0x4b1   : > { %v1626_v29 = vrot.slane %v1625_v17, 2 }
 0x4b3   : > { %v1627_v33 = vadd.f32 %v1626_v29, %v1625_v17 }
 0x4b5   : > { %v1628_v50 = vrot.slane %v1627_v33, 1 }
 0x4b7   : > { %v1629_v5 = vadd.f32 %v1628_v50, %v1627_v33 }
 0x4b9   : > { %2079 = vpush %v1629_v5 }
 0x4d2   : > { %v1327_v21 = vpop.f32.mrb[8].mxu0 }
 0x4d3   : > { %v2065_v54 = vadd.f32 %v1948_v37, %v1327_v21  ;;  %v2039_v31 = vpop.f32.mrb[9].mxu0 }
 0x4d4   : > { %v1330_v56 = vpop.f32.mrb[10].mxu0 }
 0x4d5   : > { %1337 = vst.msk [vmem:[%s614_s19] sm:$0xff] %vm1336_vm4, %v2065_v54  ;;  %v2066_v9 = vadd.f32 %v1948_v37, %v1330_v56  ;;  %v2040_v62 = vpop.f32.mrb[11].mxu0 }
 0x4d7   : > { %1338 = vst.msk [vmem:[%s614_s19 + $0x8] sm:$0xff] %vm1336_vm4, %v2066_v9 }
 0x4d8   : > { %2519 = shalt.err (!%p2516_p1)
}
 0x4d9   : > { %s2520_s26 = scalar_lea.hbm %s3424_s23, 256  ;;  %s2524_s15 = scalar_lea.hbm %s3586_s30, 512 }
 0x4da   : > { %p2521_p8 = scmp.ne.s32.totalorder %s3424_s23, %s2520_s26  ;;  %p2525_p0 = scmp.lt.u32.totalorder %s3424_s23, %s3586_s30 }
 0x4db   : > { %p2526_p9 = scmp.lt.u32.totalorder %s2524_s15, %s2520_s26  ;;  %p2528_p5 = scmp.lt.u32.totalorder %s2520_s26, %s3424_s23 }
 0x4dc   : > { %p2522_p7 = pnand %p2521_p8, %p3587_p13 }
 0x4dd   : > { %p2527_p4 = por %p2526_p9, %p2525_p0 }
 0x4de   : > { %p2523_p10 = pneg %p2522_p7 }
 0x4df   : > { %p2529_p6 = por %p2528_p5, %p2527_p4 }
 0x4e1   : > { %p2530_p11 = pnand %p2529_p6, %p2523_p10 }
 0x4e3   : > { %2533 = shalt.err (!%p2530_p11)
}
 0x4e4   : > { %s2648_s7 = smov 128   ;;  %s2649_s12 = smov 8   ;;  %vm1633_vm5 = vcmask 0  }
 0x4e5   : > { %2105 = dma.vmem_to_hbm [thread:$0]  (%p3587_p13), %s3419_s9, 256, %s3424_s23, %s1636_s21, %s2648_s7, %s2648_s7, %s2649_s12  }
 0x4e6   : > { %s1959_s25 = sshll.u32 %s2727_s17, 4  ;;  %s620_s19 = scalar_lea.vmem [#allocation19], %s3085_s24 }
 0x4e7   : > { %s1669_s13 = sshll.u32 %s620_s19, 4  ;;  %s3588_s14 = sld [smem:[#allocation42_spill]]  ;;  %s3457_s13 = int_to_ptr.vmem [resolvable:$true] %s1669_s13 }
 0x4e8   : > { %s1641_s28 = scalar_lea.sflag [#allocation20], %s3085_s24  ;;  %s2534_s9 = scalar_lea.vmem %s3457_s13, 16 }
 0x4e9   : > { %p2535_p3 = scmp.ne.s32.totalorder %s3457_s13, %s2534_s9  ;;  %s2650_s17 = smov [#allocation19]  }
 0x4ea   : > { %s2080_s22 = spop %2079  ;;  %s2538_s23 = sshll.u32 %s2650_s17, 4  ;;  %s2539_s23 = int_to_ptr.vmem [resolvable:$false] %s2538_s23 }
 0x4eb   : > { %s1631_s4 = smul.f32 0.0009765625, %s2080_s22  ;;  %p2536_p2 = pnand %p2535_p3, %p3587_p13 }
 0x4ec   : > { %s2540_s21 = scalar_lea.vmem %s2539_s23, 32  ;;  %p2541_p1 = scmp.lt.s32.totalorder %s3457_s13, %s2539_s23 }
 0x4ed   : > { %s3589_s10 = smov %s3588_s14  ;;  %s3455_s26 = scalar_lea.hbm %s3588_s14, %s1959_s25  ;;  %v1632_v39 = vstv %s1631_s4 }
 0x4ee   : > { %1634 = vst.msk [vmem:[%s620_s19] sm:$0x1] %vm1633_vm5, %v1632_v39  ;;  %p2537_p12 = pneg %p2536_p2  ;;  %p2542_p8 = scmp.lt.s32.totalorder %s2540_s21, %s2534_s9 }
 0x4f0   : > { %p2543_p7 = por %p2542_p8, %p2541_p1 }
 0x4f2   : > { %p2544_p10 = pnand %p2543_p7, %p2537_p12 }
 0x4f4   : > { %2547 = shalt.err (!%p2544_p10)
}
 0x4f5   : > { %s2548_s24 = scalar_lea.hbm %s3455_s26, 16  ;;  %s2552_s20 = scalar_lea.hbm %s3589_s10, 32 }
 0x4f6   : > { %p2549_p0 = scmp.ne.s32.totalorder %s3455_s26, %s2548_s24  ;;  %p2553_p5 = scmp.lt.u32.totalorder %s3455_s26, %s3589_s10 }
 0x4f7   : > { %p2554_p6 = scmp.lt.u32.totalorder %s2552_s20, %s2548_s24  ;;  %p2556_p3 = scmp.lt.u32.totalorder %s2548_s24, %s3455_s26 }
 0x4f8   : > { %p2550_p9 = pnand %p2549_p0, %p3587_p13 }
 0x4f9   : > { %p2555_p11 = por %p2554_p6, %p2553_p5 }
 0x4fa   : > { %p2551_p4 = pneg %p2550_p9 }
 0x4fb   : > { %p2557_p2 = por %p2556_p3, %p2555_p11 }
 0x4fd   : > { %p2558_p12 = pnand %p2557_p2, %p2551_p4 }
 0x4ff   : > { %2561 = shalt.err (!%p2558_p12)
}
 0x500   : > { %2106 = dma.vmem_to_hbm [thread:$0]  (%p3587_p13), %s3457_s13, 16, %s3455_s26, %s1641_s28  }
 0x501 PF: > { %s3590_s12 = sld [smem:[#allocation30_spill]]  ;;  %s3591_s25 = sld [smem:[#allocation37_spill]] }
 0x502   : > { %p3593_p8 = scmp.ge.s32.totalorder %s2628_s16, 2 }
 0x507   : > { %s1681_s19 = sand.u32 1, %s3590_s12   ;;  %p3592_p1 = scmp.ne.s32.totalorder %s3591_s25, 0 }
 0x508   : > { %s1682_s22 = scalar_lea.sflag [#allocation4], %s1681_s19 }
 0x509   : > { %p2139_p7 = pnand %p3593_p8, %p3592_p1 }
 0x50b   : > { %2607 = dma.done.wait (!%p2139_p7), %s1682_s22, 256  }
 0x50c   : > { %2609 = vsyncadd (!%p2139_p7), %s1682_s22, 4294967040  ;;  %s1691_s4 = scalar_lea.sflag [#allocation20], %s1681_s19 }
 0x50d   : > { %2611 = dma.done.wait (!%p2139_p7), %s1691_s4, 16  }
 0x50e   : > { %2613 = vsyncadd (!%p2139_p7), %s1691_s4, 4294967280  ;;  %s3594_s16 = sld [smem:[#allocation33_spill]]  ;;  %s3595_s13 = sld [smem:[#allocation31_spill]] }
 0x50f   : > { %s3596_s14 = sld [smem:[#allocation32_spill]]  ;;  %s3597_s15 = sld [smem:[#allocation34_spill]] }
 0x514   : > { %p38_p13 = scmp.ge.s32.totalorder %s3594_s16, 4  }
 0x516   :  { %40 = sbr.rel (!%p38_p13) target bundleno = 21 (0x15), region = 192 }
 0x51d   :  { %1695 = vsyncpa [#allocation3], 1 }
 0x51e   :  { %1697 = vsyncpa [#allocation3 + $0x1], 1 }
 0x51f   :  { %1698 = vsyncpa [#allocation8], 1 }
 0x520   :  { %1700 = vsyncpa [#allocation8 + $0x1], 1 }
 0x521   :  { %1701 = vsyncpa [#allocation11], 1 }
 0x522   :  { %1703 = vsyncpa [#allocation11 + $0x1], 1 }
 0x523   :  { %1704 = vsyncpa [#allocation14], 1 }
 0x524   :  { %1706 = vsyncpa [#allocation14 + $0x1], 1 }
 0x525   :  { %1707 = vsyncpa [#allocation17], 1 }
 0x526   :  { %1708 = vsyncpa [#allocation4], 1 }
 0x527   :  { %1710 = vsyncpa [#allocation4 + $0x1], 1 }
 0x528   :  { %1711 = vsyncpa [#allocation20], 1 }
 0x529   :  { %1713 = vsyncpa [#allocation20 + $0x1], 1 }
 0x52a   :  { %1714 = vsyncpa [#allocation5], 1 }
 0x52b   :  { %1716 = vsyncpa [#allocation5 + $0x1], 1 }

</bundles_post_ra>
